<compile_context>
chip_gen: v7x
topology: tpu7x:2x2x1
jax: 0.10.0
libtpu: 0.0.40
codegen_flags: <defaults>
</compile_context>

<pallas_src>
import functools

import jax
import jax.numpy as jnp
from jax.experimental import pallas as pl
from jax.experimental.pallas import tpu as pltpu

_BN_EPS = 1e-5
_NUM_KERNEL_SIZES = 3       # _InceptionSubModule.num_kernel_sizes
_LANE = 128
_MXU_DEPTH = 256            # v6e/v7x contraction depth (K=256 is also fine on v5e)


def _round_up(x, m):
    return ((x + m - 1) // m) * m


def _choose_row_block(n, w, max_rows=1024, min_steps=8):
    """Rows per grid step: keep BN*W <= max_rows (MXU-M / VMEM budget) while
    preferring >= min_steps grid steps (DMA/compute overlap + v7x megacore)."""
    divisors = [d for d in range(1, n + 1) if n % d == 0]
    fit = [d for d in divisors if d * w <= max_rows] or [1]
    pool = ([d for d in fit if n // d >= min_steps]
            or [d for d in fit if n // d >= 2]
            or fit)
    return max(pool)


def _prepare_layer_params(params, kernel_sizes, use_bottleneck, cin, matmul_dtype):
    """Fold eval-mode BN into the convs, fuse + zero-pad the three temporal
    branches into one tap-grouped weight, and pad all output dims to a multiple
    of 128 lanes so the kernel epilogue is a pure add + ReLU (no lane concat)."""
    wb, wk_list, wp, gamma, beta, mean, var = params
    units = wp.shape[1]
    n_branch = len(kernel_sizes)
    out_ch = (n_branch + 1) * units
    out_p = _round_up(out_ch, _LANE)
    kmax = max(kernel_sizes)
    cb = wb.shape[1] if use_bottleneck else cin
    # K-packing: one matmul per `group` taps (fills the MXU contraction depth).
    group = max(1, min(kmax, _MXU_DEPTH // max(1, cb)))
    n_groups = -(-kmax // group)
    kmax_p = n_groups * group
    L = (kmax - 1) // 2                               # PyTorch 'same' left pad

    inv = jax.lax.rsqrt(var + _BN_EPS)
    scale = (gamma * inv)[0]                          # (out_ch,)
    bias = (beta - mean * gamma * inv)[0]             # (out_ch,)

    # Fused temporal-conv weight (kmax_p taps, out_p cols), BN-scaled, zero-padded.
    wk_full = jnp.zeros((kmax_p, cb, out_p), jnp.float32)
    for j, (wk, k) in enumerate(zip(wk_list, kernel_sizes)):
        s = scale[j * units:(j + 1) * units]
        off = L - (k - 1) // 2                        # align branch taps to kmax pad
        wk_full = wk_full.at[off:off + k, :wk.shape[1],
                             j * units:(j + 1) * units].set(wk * s[None, None, :])
    wk_grouped = wk_full.reshape(n_groups, group * cb, out_p).astype(matmul_dtype)

    # Max-pool-branch 1x1 weight: rows padded to cin, only its `units` cols non-zero.
    wp_full = jnp.zeros((cin, out_p), jnp.float32)
    wp_full = wp_full.at[:wp.shape[0], n_branch * units:out_ch].set(
        wp * scale[n_branch * units:out_ch][None, :])
    wp_full = wp_full.astype(matmul_dtype)

    # Bottleneck 1x1 weight, rows padded to cin (padded input channels are zero).
    if use_bottleneck:
        wb_full = jnp.zeros((cin, cb), jnp.float32).at[:wb.shape[0], :].set(wb)
        wb_full = wb_full.astype(matmul_dtype)
    else:
        wb_full = jnp.zeros((1, 1), matmul_dtype)     # placeholder, never read

    bias_full = jnp.zeros((1, out_p), jnp.float32).at[0, :out_ch].set(bias)

    meta = dict(cb=cb, group=group, n_groups=n_groups, kmax_p=kmax_p, L=L,
                out_p=out_p, out_ch=out_ch)
    return (wb_full, wk_grouped, wp_full, bias_full), meta


def _make_kernel(metas, use_bottleneck, w, matmul_dtype):
    """Builds the depth-fused Pallas kernel (BN already folded into weights)."""
    depth = len(metas)
    L = metas[0]["L"]
    assert all(m["L"] == L for m in metas)

    def kernel(x_ref, *refs):
        out_ref, pad_ref = refs[-2], refs[-1]
        wrefs = refs[:-2]
        bn = x_ref.shape[0]
        m = bn * w
        pad_len, cb_max = pad_ref.shape[1], pad_ref.shape[2]

        # Zero the 'same'-padding halo rows once per grid step.  The scratch is
        # per-core and persistent, so re-zero defensively (cheap) — stays correct
        # when the "parallel" grid axis is sharded across TensorCores.
        if L > 0:
            pad_ref[:, :L, :] = jnp.zeros((bn, L, cb_max), pad_ref.dtype)
        if pad_len - L - w > 0:
            pad_ref[:, L + w:, :] = jnp.zeros((bn, pad_len - L - w, cb_max),
                                              pad_ref.dtype)

        cur = x_ref[...].astype(jnp.float32)           # layer input (bn, w, cin)
        for l in range(depth):
            meta = metas[l]
            wb_r, wk_r, wp_r, b_r = wrefs[4 * l:4 * (l + 1)]
            cb, G, out_p = meta["cb"], meta["group"], meta["out_p"]
            cin = cur.shape[-1]
            x2 = cur.reshape(m, cin)

            # 1) bottleneck 1x1 conv (Cin==1 degenerates to a broadcast scale).
            if use_bottleneck:
                if cin == 1:
                    inp2 = x2 * wb_r[...].astype(jnp.float32)
                else:
                    inp2 = jnp.dot(x2.astype(matmul_dtype), wb_r[...],
                                   preferred_element_type=jnp.float32)
            else:
                inp2 = x2
            # Stage the zero-padded conv input (matmul dtype) in the scratch.
            pad_ref[:, L:L + w, :cb] = inp2.reshape(bn, w, cb).astype(pad_ref.dtype)

            # 2) fused 3-branch temporal conv: one MXU matmul per G-tap group
            #    (K = G*cb fills the contraction depth, N = out_p lanes).  One
            #    aligned window load per group; shifted sub-views in-register.
            acc = jnp.zeros((m, out_p), jnp.float32)
            for g in range(meta["n_groups"]):
                win = pad_ref[:, g * G:g * G + w + G - 1, :cb]
                lhs = jnp.concatenate([win[:, d:d + w, :] for d in range(G)],
                                      axis=-1).reshape(m, G * cb)
                acc = acc + jnp.dot(lhs, wk_r[g],
                                    preferred_element_type=jnp.float32)

            # 3) MaxPool2d((1,3), stride 1, pad (0,1)) on the ORIGINAL layer
            #    input (-inf pad == edge replication), then 1x1 conv.  f32 VPU.
            prev = jnp.concatenate([cur[:, :1, :], cur[:, :w - 1, :]], axis=1)
            nxt = jnp.concatenate([cur[:, 1:, :], cur[:, w - 1:, :]], axis=1)
            mp = jnp.maximum(jnp.maximum(prev, cur), nxt).reshape(m, cin)
            if cin == 1:
                pool = mp * wp_r[...].astype(jnp.float32)
            else:
                pool = jnp.dot(mp.astype(matmul_dtype), wp_r[...],
                               preferred_element_type=jnp.float32)

            # 4) folded-BN bias + ReLU.  Branches are already out_p wide
            #    (zero-padded weight columns) => no lane concat.
            cur = jnp.maximum(acc + pool + b_r[...], 0.0).reshape(bn, w, out_p)

        out_ref[...] = cur.astype(out_ref.dtype)       # single lane-dense store

    return kernel


def inception_module(x, params, kernel_sizes, use_bottleneck=True,
                     matmul_dtype=jnp.float32, max_block_rows=1024):
    """_InceptionModule forward.  x: (B, H, W) or (B, 1, H, W) NCHW semantics.

    matmul_dtype: jnp.float32 reproduces PyTorch numerics; jnp.bfloat16 runs the
    MXU at full rate on v6e/v7x and halves weight + scratch VMEM (element-wise
    work and accumulation stay f32).
    """
    if x.ndim == 3:
        x = x[:, None, :, :]
    b, c0, h, w = x.shape
    n = b * h
    # NCHW -> (B*H, W, C): channels on lanes, time on sublanes.  W a multiple of
    # 8 keeps the (BN, W, C) <-> (BN*W, C) reshapes tile-aligned (best perf).
    xk = jnp.transpose(x, (0, 2, 3, 1)).reshape(n, w, c0)

    layer_ops, metas = [], []
    cin = c0
    for p in params:
        ops, meta = _prepare_layer_params(p, kernel_sizes, use_bottleneck, cin,
                                          matmul_dtype)
        layer_ops.append(ops)
        metas.append(meta)
        cin = meta["out_p"]
    out_p, out_ch = metas[-1]["out_p"], metas[-1]["out_ch"]

    cb_max = max(m["cb"] for m in metas)
    pad_len = w + max(m["kmax_p"] for m in metas) - 1
    bn_rows = _choose_row_block(n, w, max_rows=max_block_rows)

    kernel = _make_kernel(metas, use_bottleneck, w, matmul_dtype)

    def _full_spec(a):
        nd = a.ndim
        return pl.BlockSpec(a.shape, lambda i, _nd=nd: (0,) * _nd)

    flat_ops = [a for ops in layer_ops for a in ops]
    y = pl.pallas_call(
        kernel,
        out_shape=jax.ShapeDtypeStruct((n, w, out_p), jnp.float32),
        grid=(n // bn_rows,),
        in_specs=[pl.BlockSpec((bn_rows, w, c0), lambda i: (i, 0, 0))]
                 + [_full_spec(a) for a in flat_ops],
        out_specs=pl.BlockSpec((bn_rows, w, out_p), lambda i: (i, 0, 0)),
        scratch_shapes=[pltpu.VMEM((bn_rows, pad_len, cb_max), matmul_dtype)],
        compiler_params=pltpu.CompilerParams(
            dimension_semantics=("parallel",),
            vmem_limit_bytes=48 * 1024 * 1024),   # headroom below v7x's 64 MiB/TC
    )(xk, *flat_ops)

    y = y[..., :out_ch]
    return jnp.transpose(y.reshape(b, h, w, out_ch), (0, 3, 1, 2))


def init_inception_module_params(key, cnn_units=32, depth=6, use_bottleneck=True,
                                 max_kernel_size=40, bottleneck_units=32):
    """Deterministic synthetic parameters matching the PyTorch module's shapes."""
    kernel_sizes = [max_kernel_size // 2 ** i for i in range(_NUM_KERNEL_SIZES)]
    out_channels = cnn_units * (_NUM_KERNEL_SIZES + 1)
    in_channels_list = [1] + [out_channels] * (depth - 1)

    params = []
    for i, cin in enumerate(in_channels_list):
        k = jax.random.fold_in(key, i)
        ks = jax.random.split(k, 9)
        conv_in = bottleneck_units if use_bottleneck else cin
        # Conv2d(in=cin, out=bottleneck, k=1) weight -> (cin, bottleneck)
        wb = jax.random.normal(ks[0], (cin, bottleneck_units), jnp.float32) / jnp.sqrt(cin)
        # Conv2d(in=conv_in, out=units, k=(1,kj)) weight -> (kj, conv_in, units)
        wk_list = [
            jax.random.normal(ks[1 + j], (kj, conv_in, cnn_units), jnp.float32)
            / jnp.sqrt(conv_in * kj)
            for j, kj in enumerate(kernel_sizes)
        ]
        # Conv2d(in=cin, out=units, k=1) after max-pool -> (cin, units)
        wp = jax.random.normal(ks[4], (cin, cnn_units), jnp.float32) / jnp.sqrt(cin)
        # BatchNorm2d(4*units) parameters / running stats, kept as (1, 4*units)
        gamma = 1.0 + 0.1 * jax.random.normal(ks[5], (1, out_channels), jnp.float32)
        beta = 0.1 * jax.random.normal(ks[6], (1, out_channels), jnp.float32)
        mean = 0.1 * jax.random.normal(ks[7], (1, out_channels), jnp.float32)
        var = 0.5 + jax.random.uniform(ks[8], (1, out_channels), jnp.float32)
        params.append((wb, wk_list, wp, gamma, beta, mean, var))
    return params, kernel_sizes


# ----------------------------- pure-JAX reference -----------------------------
def _reference_submodule(x, params, kernel_sizes, use_bottleneck):
    wb, wk_list, wp, gamma, beta, mean, var = params
    n, w, cin = x.shape
    inp = jnp.einsum('nwc,cd->nwd', x, wb) if use_bottleneck else x
    outs = []
    for wk, k in zip(wk_list, kernel_sizes):
        lk = (k - 1) // 2
        p = jnp.pad(inp, ((0, 0), (lk, k - 1 - lk), (0, 0)))
        acc = sum(jnp.einsum('nwc,cd->nwd', p[:, j:j + w, :], wk[j])
                  for j in range(k))
        outs.append(acc)
    prev = jnp.concatenate([x[:, :1], x[:, :-1]], axis=1)
    nxt = jnp.concatenate([x[:, 1:], x[:, -1:]], axis=1)
    mp = jnp.maximum(jnp.maximum(prev, x), nxt)
    outs.append(jnp.einsum('nwc,cd->nwd', mp, wp))
    y = jnp.concatenate(outs, axis=-1)
    scale = gamma * jax.lax.rsqrt(var + _BN_EPS)
    return jnp.maximum(y * scale + (beta - mean * scale), 0.0)


def _reference_module(x, params, kernel_sizes, use_bottleneck=True):
    if x.ndim == 3:
        x = x[:, None, :, :]
    b, c, h, w = x.shape
    xk = jnp.transpose(x, (0, 2, 3, 1)).reshape(b * h, w, c)
    for p in params:
        xk = _reference_submodule(xk, p, kernel_sizes, use_bottleneck)
    c_out = xk.shape[-1]
    return jnp.transpose(xk.reshape(b, h, w, c_out), (0, 3, 1, 2))


if __name__ == "__main__":
    key = jax.random.PRNGKey(0)

    # Small shapes consistent with the module: (batch, eeg_channels, time_steps)
    B, H, W = 2, 4, 64
    cnn_units, depth, max_kernel_size = 32, 2, 16   # out_ch = 128 (lane-dense)
    use_bottleneck = True

    x = jax.random.normal(jax.random.fold_in(key, 100), (B, H, W), jnp.float32)
    params, kernel_sizes = init_inception_module_params(
        jax.random.fold_in(key, 1),
        cnn_units=cnn_units,
        depth=depth,
        use_bottleneck=use_bottleneck,
        max_kernel_size=max_kernel_size,
    )

    # Exact-semantics (f32 MXU) path, checked tightly against the unfused reference.
    run_f32 = jax.jit(functools.partial(
        inception_module, kernel_sizes=tuple(kernel_sizes),
        use_bottleneck=use_bottleneck, matmul_dtype=jnp.float32))
    out = jax.block_until_ready(run_f32(x, params))

    expected_channels = cnn_units * (_NUM_KERNEL_SIZES + 1)
    assert out.shape == (B, expected_channels, H, W), out.shape
    assert bool(jnp.all(jnp.isfinite(out)))

    ref = _reference_module(x, params, kernel_sizes, use_bottleneck)
    err = float(jnp.max(jnp.abs(out - ref)))
    tol = 1e-3 * (float(jnp.max(jnp.abs(ref))) + 1.0)
    assert err <= tol, (err, tol)

    # bf16-MXU path (recommended on v6e/v7x): shape + finiteness sanity check
    # (bf16 error compounds across layers, so no tight tolerance here).
    run_bf16 = jax.jit(functools.partial(
        inception_module, kernel_sizes=tuple(kernel_sizes),
        use_bottleneck=use_bottleneck, matmul_dtype=jnp.bfloat16))
    out_bf16 = jax.block_until_ready(run_bf16(x, params))
    assert out_bf16.shape == out.shape
    assert bool(jnp.all(jnp.isfinite(out_bf16)))

    print("KERNEL_OK")
</pallas_src>

<mosaic_0001>
module attributes {stable_mosaic.version = 11 : i64} {
  func.func @kernel(%arg0: i32, %arg1: memref<1x64x1xf32, #tpu.memory_space<vmem>>, %arg2: memref<1x32xf32, #tpu.memory_space<vmem>>, %arg3: memref<2x256x128xf32, #tpu.memory_space<vmem>>, %arg4: memref<1x128xf32, #tpu.memory_space<vmem>>, %arg5: memref<1x128xf32, #tpu.memory_space<vmem>>, %arg6: memref<128x32xf32, #tpu.memory_space<vmem>>, %arg7: memref<2x256x128xf32, #tpu.memory_space<vmem>>, %arg8: memref<128x128xf32, #tpu.memory_space<vmem>>, %arg9: memref<1x128xf32, #tpu.memory_space<vmem>>, %arg10: memref<1x64x128xf32, #tpu.memory_space<vmem>>, %arg11: memref<1x79x32xf32, #tpu.memory_space<vmem>>) attributes {dimension_semantics = [#tpu.dimension_semantics<parallel>], iteration_bounds = array<i64: 8>, scalar_prefetch = 0 : i64, scratch_operands = 1 : i64, tpu.core_type = #tpu.core_type<tc>, window_params = [{transform_indices = @transform_0, window_bounds = array<i64: 1, 64, 1>}, {pipeline_mode = #tpu.pipeline_mode<synchronous>, transform_indices = @transform_1, window_bounds = array<i64: 1, 32>}, {pipeline_mode = #tpu.pipeline_mode<synchronous>, transform_indices = @transform_2, window_bounds = array<i64: 2, 256, 128>}, {pipeline_mode = #tpu.pipeline_mode<synchronous>, transform_indices = @transform_3, window_bounds = array<i64: 1, 128>}, {pipeline_mode = #tpu.pipeline_mode<synchronous>, transform_indices = @transform_4, window_bounds = array<i64: 1, 128>}, {pipeline_mode = #tpu.pipeline_mode<synchronous>, transform_indices = @transform_5, window_bounds = array<i64: 128, 32>}, {pipeline_mode = #tpu.pipeline_mode<synchronous>, transform_indices = @transform_6, window_bounds = array<i64: 2, 256, 128>}, {pipeline_mode = #tpu.pipeline_mode<synchronous>, transform_indices = @transform_7, window_bounds = array<i64: 128, 128>}, {pipeline_mode = #tpu.pipeline_mode<synchronous>, transform_indices = @transform_8, window_bounds = array<i64: 1, 128>}, {transform_indices = @transform_9, window_bounds = array<i64: 1, 64, 128>}]} {
    %cst = arith.constant 0.000000e+00 : f32
    %0 = vector.broadcast %cst : f32 to vector<1x7x32xf32>
    %c0 = arith.constant 0 : index
    %c0_0 = arith.constant 0 : index
    %c0_1 = arith.constant 0 : index
    %1 = vector.load %arg11[%c0, %c0_0, %c0_1] : memref<1x79x32xf32, #tpu.memory_space<vmem>>, vector<1x7x32xf32>
    tpu.vector_store %arg11[%c0, %c0_0, %c0_1], %0 {strides = array<i32>} : memref<1x79x32xf32, #tpu.memory_space<vmem>>, vector<1x7x32xf32>,
    %cst_2 = arith.constant 0.000000e+00 : f32
    %2 = vector.broadcast %cst_2 : f32 to vector<1x8x32xf32>
    %c0_3 = arith.constant 0 : index
    %c71 = arith.constant 71 : index
    %c0_4 = arith.constant 0 : index
    %3 = vector.load %arg11[%c0_3, %c71, %c0_4] : memref<1x79x32xf32, #tpu.memory_space<vmem>>, vector<1x8x32xf32>
    tpu.vector_store %arg11[%c0_3, %c71, %c0_4], %2 {strides = array<i32>} : memref<1x79x32xf32, #tpu.memory_space<vmem>>, vector<1x8x32xf32>,
    %c0_5 = arith.constant 0 : index
    %c0_6 = arith.constant 0 : index
    %c0_7 = arith.constant 0 : index
    %4 = vector.load %arg1[%c0_5, %c0_6, %c0_7] : memref<1x64x1xf32, #tpu.memory_space<vmem>>, vector<1x64x1xf32>
    %5 = vector.shape_cast %4 : vector<1x64x1xf32> to vector<64x1xf32>
    %c0_8 = arith.constant 0 : index
    %c0_9 = arith.constant 0 : index
    %6 = vector.load %arg2[%c0_8, %c0_9] : memref<1x32xf32, #tpu.memory_space<vmem>>, vector<1x32xf32>
    %7 = vector.broadcast %5 : vector<64x1xf32> to vector<64x32xf32>
    %8 = vector.broadcast %6 : vector<1x32xf32> to vector<64x32xf32>
    %9 = arith.mulf %7, %8 : vector<64x32xf32>
    %10 = vector.shape_cast %9 : vector<64x32xf32> to vector<1x64x32xf32>
    %c0_10 = arith.constant 0 : index
    %c7 = arith.constant 7 : index
    %c0_11 = arith.constant 0 : index
    %11 = vector.load %arg11[%c0_10, %c7, %c0_11] : memref<1x79x32xf32, #tpu.memory_space<vmem>>, vector<1x64x32xf32>
    tpu.vector_store %arg11[%c0_10, %c7, %c0_11], %10 {strides = array<i32>} : memref<1x79x32xf32, #tpu.memory_space<vmem>>, vector<1x64x32xf32>,
    %cst_12 = arith.constant 0.000000e+00 : f32
    %12 = vector.broadcast %cst_12 : f32 to vector<64x128xf32>
    %c0_13 = arith.constant 0 : index
    %c0_14 = arith.constant 0 : index
    %c0_15 = arith.constant 0 : index
    %13 = vector.load %arg11[%c0_13, %c0_14, %c0_15] : memref<1x79x32xf32, #tpu.memory_space<vmem>>, vector<1x71x32xf32>
    %14 = vector.extract_strided_slice %13 {offsets = [0, 0, 0], sizes = [1, 64, 32], strides = [1, 1, 1]} : vector<1x71x32xf32> to vector<1x64x32xf32>
    %15 = vector.extract_strided_slice %13 {offsets = [0, 1, 0], sizes = [1, 64, 32], strides = [1, 1, 1]} : vector<1x71x32xf32> to vector<1x64x32xf32>
    %16 = vector.extract_strided_slice %13 {offsets = [0, 2, 0], sizes = [1, 64, 32], strides = [1, 1, 1]} : vector<1x71x32xf32> to vector<1x64x32xf32>
    %17 = vector.extract_strided_slice %13 {offsets = [0, 3, 0], sizes = [1, 64, 32], strides = [1, 1, 1]} : vector<1x71x32xf32> to vector<1x64x32xf32>
    %18 = vector.extract_strided_slice %13 {offsets = [0, 4, 0], sizes = [1, 64, 32], strides = [1, 1, 1]} : vector<1x71x32xf32> to vector<1x64x32xf32>
    %19 = vector.extract_strided_slice %13 {offsets = [0, 5, 0], sizes = [1, 64, 32], strides = [1, 1, 1]} : vector<1x71x32xf32> to vector<1x64x32xf32>
    %20 = vector.extract_strided_slice %13 {offsets = [0, 6, 0], sizes = [1, 64, 32], strides = [1, 1, 1]} : vector<1x71x32xf32> to vector<1x64x32xf32>
    %21 = vector.extract_strided_slice %13 {offsets = [0, 7, 0], sizes = [1, 64, 32], strides = [1, 1, 1]} : vector<1x71x32xf32> to vector<1x64x32xf32>
    %22 = tpu.concatenate %14, %15, %16, %17, %18, %19, %20, %21 in 2 : vector<1x64x32xf32>, vector<1x64x32xf32>, vector<1x64x32xf32>, vector<1x64x32xf32>, vector<1x64x32xf32>, vector<1x64x32xf32>, vector<1x64x32xf32>, vector<1x64x32xf32> -> vector<1x64x256xf32>
    %23 = vector.shape_cast %22 : vector<1x64x256xf32> to vector<64x256xf32>
    %c0_16 = arith.constant 0 : index
    %c0_17 = arith.constant 0 : index
    %c0_18 = arith.constant 0 : index
    %24 = vector.load %arg3[%c0_16, %c0_17, %c0_18] : memref<2x256x128xf32, #tpu.memory_space<vmem>>, vector<1x256x128xf32>
    %25 = vector.shape_cast %24 : vector<1x256x128xf32> to vector<256x128xf32>
    %cst_19 = arith.constant dense<0.000000e+00> : vector<64x128xf32>
    %26 = tpu.matmul %23, %25, %cst_19 {dimension_numbers = #tpu.dot_dimension_numbers<[1], [0], [0], [1], [0, 0, 1, 1], [], []>} : vector<64x256xf32>, vector<256x128xf32>, vector<64x128xf32> -> vector<64x128xf32>
    %27 = arith.addf %12, %26 : vector<64x128xf32>
    %c0_20 = arith.constant 0 : index
    %c8 = arith.constant 8 : index
    %c0_21 = arith.constant 0 : index
    %28 = vector.load %arg11[%c0_20, %c8, %c0_21] : memref<1x79x32xf32, #tpu.memory_space<vmem>>, vector<1x71x32xf32>
    %29 = vector.extract_strided_slice %28 {offsets = [0, 0, 0], sizes = [1, 64, 32], strides = [1, 1, 1]} : vector<1x71x32xf32> to vector<1x64x32xf32>
    %30 = vector.extract_strided_slice %28 {offsets = [0, 1, 0], sizes = [1, 64, 32], strides = [1, 1, 1]} : vector<1x71x32xf32> to vector<1x64x32xf32>
    %31 = vector.extract_strided_slice %28 {offsets = [0, 2, 0], sizes = [1, 64, 32], strides = [1, 1, 1]} : vector<1x71x32xf32> to vector<1x64x32xf32>
    %32 = vector.extract_strided_slice %28 {offsets = [0, 3, 0], sizes = [1, 64, 32], strides = [1, 1, 1]} : vector<1x71x32xf32> to vector<1x64x32xf32>
    %33 = vector.extract_strided_slice %28 {offsets = [0, 4, 0], sizes = [1, 64, 32], strides = [1, 1, 1]} : vector<1x71x32xf32> to vector<1x64x32xf32>
    %34 = vector.extract_strided_slice %28 {offsets = [0, 5, 0], sizes = [1, 64, 32], strides = [1, 1, 1]} : vector<1x71x32xf32> to vector<1x64x32xf32>
    %35 = vector.extract_strided_slice %28 {offsets = [0, 6, 0], sizes = [1, 64, 32], strides = [1, 1, 1]} : vector<1x71x32xf32> to vector<1x64x32xf32>
    %36 = vector.extract_strided_slice %28 {offsets = [0, 7, 0], sizes = [1, 64, 32], strides = [1, 1, 1]} : vector<1x71x32xf32> to vector<1x64x32xf32>
    %37 = tpu.concatenate %29, %30, %31, %32, %33, %34, %35, %36 in 2 : vector<1x64x32xf32>, vector<1x64x32xf32>, vector<1x64x32xf32>, vector<1x64x32xf32>, vector<1x64x32xf32>, vector<1x64x32xf32>, vector<1x64x32xf32>, vector<1x64x32xf32> -> vector<1x64x256xf32>
    %38 = vector.shape_cast %37 : vector<1x64x256xf32> to vector<64x256xf32>
    %c1 = arith.constant 1 : index
    %c0_22 = arith.constant 0 : index
    %c0_23 = arith.constant 0 : index
    %39 = vector.load %arg3[%c1, %c0_22, %c0_23] : memref<2x256x128xf32, #tpu.memory_space<vmem>>, vector<1x256x128xf32>
    %40 = vector.shape_cast %39 : vector<1x256x128xf32> to vector<256x128xf32>
    %cst_24 = arith.constant dense<0.000000e+00> : vector<64x128xf32>
    %41 = tpu.matmul %38, %40, %cst_24 {dimension_numbers = #tpu.dot_dimension_numbers<[1], [0], [0], [1], [0, 0, 1, 1], [], []>} : vector<64x256xf32>, vector<256x128xf32>, vector<64x128xf32> -> vector<64x128xf32>
    %42 = arith.addf %27, %41 : vector<64x128xf32>
    %43 = vector.extract_strided_slice %4 {offsets = [0, 0, 0], sizes = [1, 1, 1], strides = [1, 1, 1]} : vector<1x64x1xf32> to vector<1x1x1xf32>
    %44 = vector.extract_strided_slice %4 {offsets = [0, 0, 0], sizes = [1, 63, 1], strides = [1, 1, 1]} : vector<1x64x1xf32> to vector<1x63x1xf32>
    %45 = tpu.concatenate %43, %44 in 1 : vector<1x1x1xf32>, vector<1x63x1xf32> -> vector<1x64x1xf32>
    %46 = vector.extract_strided_slice %4 {offsets = [0, 1, 0], sizes = [1, 63, 1], strides = [1, 1, 1]} : vector<1x64x1xf32> to vector<1x63x1xf32>
    %47 = vector.extract_strided_slice %4 {offsets = [0, 63, 0], sizes = [1, 1, 1], strides = [1, 1, 1]} : vector<1x64x1xf32> to vector<1x1x1xf32>
    %48 = tpu.concatenate %46, %47 in 1 : vector<1x63x1xf32>, vector<1x1x1xf32> -> vector<1x64x1xf32>
    %49 = arith.maximumf %45, %4 : vector<1x64x1xf32>
    %50 = arith.maximumf %49, %48 : vector<1x64x1xf32>
    %51 = vector.shape_cast %50 : vector<1x64x1xf32> to vector<64x1xf32>
    %c0_25 = arith.constant 0 : index
    %c0_26 = arith.constant 0 : index
    %52 = vector.load %arg4[%c0_25, %c0_26] : memref<1x128xf32, #tpu.memory_space<vmem>>, vector<1x128xf32>
    %53 = vector.broadcast %51 : vector<64x1xf32> to vector<64x128xf32>
    %54 = vector.broadcast %52 : vector<1x128xf32> to vector<64x128xf32>
    %55 = arith.mulf %53, %54 : vector<64x128xf32>
    %56 = arith.addf %42, %55 : vector<64x128xf32>
    %c0_27 = arith.constant 0 : index
    %c0_28 = arith.constant 0 : index
    %57 = vector.load %arg5[%c0_27, %c0_28] : memref<1x128xf32, #tpu.memory_space<vmem>>, vector<1x128xf32>
    %58 = vector.broadcast %57 : vector<1x128xf32> to vector<64x128xf32>
    %59 = arith.addf %56, %58 : vector<64x128xf32>
    %cst_29 = arith.constant 0.000000e+00 : f32
    %60 = vector.broadcast %cst_29 : f32 to vector<64x128xf32>
    %61 = arith.maximumf %59, %60 : vector<64x128xf32>
    %62 = vector.shape_cast %61 : vector<64x128xf32> to vector<1x64x128xf32>
    %63 = vector.shape_cast %62 : vector<1x64x128xf32> to vector<64x128xf32>
    %c0_30 = arith.constant 0 : index
    %c0_31 = arith.constant 0 : index
    %64 = vector.load %arg6[%c0_30, %c0_31] : memref<128x32xf32, #tpu.memory_space<vmem>>, vector<128x32xf32>
    %cst_32 = arith.constant dense<0.000000e+00> : vector<64x32xf32>
    %65 = tpu.matmul %63, %64, %cst_32 {dimension_numbers = #tpu.dot_dimension_numbers<[1], [0], [0], [1], [0, 0, 1, 1], [], []>} : vector<64x128xf32>, vector<128x32xf32>, vector<64x32xf32> -> vector<64x32xf32>
    %66 = vector.shape_cast %65 : vector<64x32xf32> to vector<1x64x32xf32>
    %c0_33 = arith.constant 0 : index
    %c7_34 = arith.constant 7 : index
    %c0_35 = arith.constant 0 : index
    %67 = vector.load %arg11[%c0_33, %c7_34, %c0_35] : memref<1x79x32xf32, #tpu.memory_space<vmem>>, vector<1x64x32xf32>
    tpu.vector_store %arg11[%c0_33, %c7_34, %c0_35], %66 {strides = array<i32>} : memref<1x79x32xf32, #tpu.memory_space<vmem>>, vector<1x64x32xf32>,
    %cst_36 = arith.constant 0.000000e+00 : f32
    %68 = vector.broadcast %cst_36 : f32 to vector<64x128xf32>
    %c0_37 = arith.constant 0 : index
    %c0_38 = arith.constant 0 : index
    %c0_39 = arith.constant 0 : index
    %69 = vector.load %arg11[%c0_37, %c0_38, %c0_39] : memref<1x79x32xf32, #tpu.memory_space<vmem>>, vector<1x71x32xf32>
    %70 = vector.extract_strided_slice %69 {offsets = [0, 0, 0], sizes = [1, 64, 32], strides = [1, 1, 1]} : vector<1x71x32xf32> to vector<1x64x32xf32>
    %71 = vector.extract_strided_slice %69 {offsets = [0, 1, 0], sizes = [1, 64, 32], strides = [1, 1, 1]} : vector<1x71x32xf32> to vector<1x64x32xf32>
    %72 = vector.extract_strided_slice %69 {offsets = [0, 2, 0], sizes = [1, 64, 32], strides = [1, 1, 1]} : vector<1x71x32xf32> to vector<1x64x32xf32>
    %73 = vector.extract_strided_slice %69 {offsets = [0, 3, 0], sizes = [1, 64, 32], strides = [1, 1, 1]} : vector<1x71x32xf32> to vector<1x64x32xf32>
    %74 = vector.extract_strided_slice %69 {offsets = [0, 4, 0], sizes = [1, 64, 32], strides = [1, 1, 1]} : vector<1x71x32xf32> to vector<1x64x32xf32>
    %75 = vector.extract_strided_slice %69 {offsets = [0, 5, 0], sizes = [1, 64, 32], strides = [1, 1, 1]} : vector<1x71x32xf32> to vector<1x64x32xf32>
    %76 = vector.extract_strided_slice %69 {offsets = [0, 6, 0], sizes = [1, 64, 32], strides = [1, 1, 1]} : vector<1x71x32xf32> to vector<1x64x32xf32>
    %77 = vector.extract_strided_slice %69 {offsets = [0, 7, 0], sizes = [1, 64, 32], strides = [1, 1, 1]} : vector<1x71x32xf32> to vector<1x64x32xf32>
    %78 = tpu.concatenate %70, %71, %72, %73, %74, %75, %76, %77 in 2 : vector<1x64x32xf32>, vector<1x64x32xf32>, vector<1x64x32xf32>, vector<1x64x32xf32>, vector<1x64x32xf32>, vector<1x64x32xf32>, vector<1x64x32xf32>, vector<1x64x32xf32> -> vector<1x64x256xf32>
    %79 = vector.shape_cast %78 : vector<1x64x256xf32> to vector<64x256xf32>
    %c0_40 = arith.constant 0 : index
    %c0_41 = arith.constant 0 : index
    %c0_42 = arith.constant 0 : index
    %80 = vector.load %arg7[%c0_40, %c0_41, %c0_42] : memref<2x256x128xf32, #tpu.memory_space<vmem>>, vector<1x256x128xf32>
    %81 = vector.shape_cast %80 : vector<1x256x128xf32> to vector<256x128xf32>
    %cst_43 = arith.constant dense<0.000000e+00> : vector<64x128xf32>
    %82 = tpu.matmul %79, %81, %cst_43 {dimension_numbers = #tpu.dot_dimension_numbers<[1], [0], [0], [1], [0, 0, 1, 1], [], []>} : vector<64x256xf32>, vector<256x128xf32>, vector<64x128xf32> -> vector<64x128xf32>
    %83 = arith.addf %68, %82 : vector<64x128xf32>
    %c0_44 = arith.constant 0 : index
    %c8_45 = arith.constant 8 : index
    %c0_46 = arith.constant 0 : index
    %84 = vector.load %arg11[%c0_44, %c8_45, %c0_46] : memref<1x79x32xf32, #tpu.memory_space<vmem>>, vector<1x71x32xf32>
    %85 = vector.extract_strided_slice %84 {offsets = [0, 0, 0], sizes = [1, 64, 32], strides = [1, 1, 1]} : vector<1x71x32xf32> to vector<1x64x32xf32>
    %86 = vector.extract_strided_slice %84 {offsets = [0, 1, 0], sizes = [1, 64, 32], strides = [1, 1, 1]} : vector<1x71x32xf32> to vector<1x64x32xf32>
    %87 = vector.extract_strided_slice %84 {offsets = [0, 2, 0], sizes = [1, 64, 32], strides = [1, 1, 1]} : vector<1x71x32xf32> to vector<1x64x32xf32>
    %88 = vector.extract_strided_slice %84 {offsets = [0, 3, 0], sizes = [1, 64, 32], strides = [1, 1, 1]} : vector<1x71x32xf32> to vector<1x64x32xf32>
    %89 = vector.extract_strided_slice %84 {offsets = [0, 4, 0], sizes = [1, 64, 32], strides = [1, 1, 1]} : vector<1x71x32xf32> to vector<1x64x32xf32>
    %90 = vector.extract_strided_slice %84 {offsets = [0, 5, 0], sizes = [1, 64, 32], strides = [1, 1, 1]} : vector<1x71x32xf32> to vector<1x64x32xf32>
    %91 = vector.extract_strided_slice %84 {offsets = [0, 6, 0], sizes = [1, 64, 32], strides = [1, 1, 1]} : vector<1x71x32xf32> to vector<1x64x32xf32>
    %92 = vector.extract_strided_slice %84 {offsets = [0, 7, 0], sizes = [1, 64, 32], strides = [1, 1, 1]} : vector<1x71x32xf32> to vector<1x64x32xf32>
    %93 = tpu.concatenate %85, %86, %87, %88, %89, %90, %91, %92 in 2 : vector<1x64x32xf32>, vector<1x64x32xf32>, vector<1x64x32xf32>, vector<1x64x32xf32>, vector<1x64x32xf32>, vector<1x64x32xf32>, vector<1x64x32xf32>, vector<1x64x32xf32> -> vector<1x64x256xf32>
    %94 = vector.shape_cast %93 : vector<1x64x256xf32> to vector<64x256xf32>
    %c1_47 = arith.constant 1 : index
    %c0_48 = arith.constant 0 : index
    %c0_49 = arith.constant 0 : index
    %95 = vector.load %arg7[%c1_47, %c0_48, %c0_49] : memref<2x256x128xf32, #tpu.memory_space<vmem>>, vector<1x256x128xf32>
    %96 = vector.shape_cast %95 : vector<1x256x128xf32> to vector<256x128xf32>
    %cst_50 = arith.constant dense<0.000000e+00> : vector<64x128xf32>
    %97 = tpu.matmul %94, %96, %cst_50 {dimension_numbers = #tpu.dot_dimension_numbers<[1], [0], [0], [1], [0, 0, 1, 1], [], []>} : vector<64x256xf32>, vector<256x128xf32>, vector<64x128xf32> -> vector<64x128xf32>
    %98 = arith.addf %83, %97 : vector<64x128xf32>
    %99 = vector.extract_strided_slice %62 {offsets = [0, 0, 0], sizes = [1, 1, 128], strides = [1, 1, 1]} : vector<1x64x128xf32> to vector<1x1x128xf32>
    %100 = vector.extract_strided_slice %62 {offsets = [0, 0, 0], sizes = [1, 63, 128], strides = [1, 1, 1]} : vector<1x64x128xf32> to vector<1x63x128xf32>
    %101 = tpu.concatenate %99, %100 in 1 : vector<1x1x128xf32>, vector<1x63x128xf32> -> vector<1x64x128xf32>
    %102 = vector.extract_strided_slice %62 {offsets = [0, 1, 0], sizes = [1, 63, 128], strides = [1, 1, 1]} : vector<1x64x128xf32> to vector<1x63x128xf32>
    %103 = vector.extract_strided_slice %62 {offsets = [0, 63, 0], sizes = [1, 1, 128], strides = [1, 1, 1]} : vector<1x64x128xf32> to vector<1x1x128xf32>
    %104 = tpu.concatenate %102, %103 in 1 : vector<1x63x128xf32>, vector<1x1x128xf32> -> vector<1x64x128xf32>
    %105 = arith.maximumf %101, %62 : vector<1x64x128xf32>
    %106 = arith.maximumf %105, %104 : vector<1x64x128xf32>
    %107 = vector.shape_cast %106 : vector<1x64x128xf32> to vector<64x128xf32>
    %c0_51 = arith.constant 0 : index
    %c0_52 = arith.constant 0 : index
    %108 = vector.load %arg8[%c0_51, %c0_52] : memref<128x128xf32, #tpu.memory_space<vmem>>, vector<128x128xf32>
    %cst_53 = arith.constant dense<0.000000e+00> : vector<64x128xf32>
    %109 = tpu.matmul %107, %108, %cst_53 {dimension_numbers = #tpu.dot_dimension_numbers<[1], [0], [0], [1], [0, 0, 1, 1], [], []>} : vector<64x128xf32>, vector<128x128xf32>, vector<64x128xf32> -> vector<64x128xf32>
    %110 = arith.addf %98, %109 : vector<64x128xf32>
    %c0_54 = arith.constant 0 : index
    %c0_55 = arith.constant 0 : index
    %111 = vector.load %arg9[%c0_54, %c0_55] : memref<1x128xf32, #tpu.memory_space<vmem>>, vector<1x128xf32>
    %112 = vector.broadcast %111 : vector<1x128xf32> to vector<64x128xf32>
    %113 = arith.addf %110, %112 : vector<64x128xf32>
    %cst_56 = arith.constant 0.000000e+00 : f32
    %114 = vector.broadcast %cst_56 : f32 to vector<64x128xf32>
    %115 = arith.maximumf %113, %114 : vector<64x128xf32>
    %116 = vector.shape_cast %115 : vector<64x128xf32> to vector<1x64x128xf32>
    %c0_57 = arith.constant 0 : index
    %c0_58 = arith.constant 0 : index
    %c0_59 = arith.constant 0 : index
    %117 = vector.load %arg10[%c0_57, %c0_58, %c0_59] : memref<1x64x128xf32, #tpu.memory_space<vmem>>, vector<1x64x128xf32>
    tpu.vector_store %arg10[%c0_57, %c0_58, %c0_59], %116 {strides = array<i32>} : memref<1x64x128xf32, #tpu.memory_space<vmem>>, vector<1x64x128xf32>,
    return
  }
  func.func @transform_0(%arg0: i32) -> (i32, i32, i32) {
    %c0_i32 = arith.constant 0 : i32
    %c0_i32_0 = arith.constant 0 : i32
    %c0_i32_1 = arith.constant 0 : i32
    return %arg0, %c0_i32, %c0_i32_0 : i32, i32, i32
  }
  func.func @transform_1(%arg0: i32) -> (i32, i32) {
    %c0_i32 = arith.constant 0 : i32
    %c0_i32_0 = arith.constant 0 : i32
    %c0_i32_1 = arith.constant 0 : i32
    return %c0_i32, %c0_i32_0 : i32, i32
  }
  func.func @transform_2(%arg0: i32) -> (i32, i32, i32) {
    %c0_i32 = arith.constant 0 : i32
    %c0_i32_0 = arith.constant 0 : i32
    %c0_i32_1 = arith.constant 0 : i32
    %c0_i32_2 = arith.constant 0 : i32
    return %c0_i32, %c0_i32_0, %c0_i32_1 : i32, i32, i32
  }
  func.func @transform_3(%arg0: i32) -> (i32, i32) {
    %c0_i32 = arith.constant 0 : i32
    %c0_i32_0 = arith.constant 0 : i32
    %c0_i32_1 = arith.constant 0 : i32
    return %c0_i32, %c0_i32_0 : i32, i32
  }
  func.func @transform_4(%arg0: i32) -> (i32, i32) {
    %c0_i32 = arith.constant 0 : i32
    %c0_i32_0 = arith.constant 0 : i32
    %c0_i32_1 = arith.constant 0 : i32
    return %c0_i32, %c0_i32_0 : i32, i32
  }
  func.func @transform_5(%arg0: i32) -> (i32, i32) {
    %c0_i32 = arith.constant 0 : i32
    %c0_i32_0 = arith.constant 0 : i32
    %c0_i32_1 = arith.constant 0 : i32
    return %c0_i32, %c0_i32_0 : i32, i32
  }
  func.func @transform_6(%arg0: i32) -> (i32, i32, i32) {
    %c0_i32 = arith.constant 0 : i32
    %c0_i32_0 = arith.constant 0 : i32
    %c0_i32_1 = arith.constant 0 : i32
    %c0_i32_2 = arith.constant 0 : i32
    return %c0_i32, %c0_i32_0, %c0_i32_1 : i32, i32, i32
  }
  func.func @transform_7(%arg0: i32) -> (i32, i32) {
    %c0_i32 = arith.constant 0 : i32
    %c0_i32_0 = arith.constant 0 : i32
    %c0_i32_1 = arith.constant 0 : i32
    return %c0_i32, %c0_i32_0 : i32, i32
  }
  func.func @transform_8(%arg0: i32) -> (i32, i32) {
    %c0_i32 = arith.constant 0 : i32
    %c0_i32_0 = arith.constant 0 : i32
    %c0_i32_1 = arith.constant 0 : i32
    return %c0_i32, %c0_i32_0 : i32, i32
  }
  func.func @transform_9(%arg0: i32) -> (i32, i32, i32) {
    %c0_i32 = arith.constant 0 : i32
    %c0_i32_0 = arith.constant 0 : i32
    %c0_i32_1 = arith.constant 0 : i32
    return %arg0, %c0_i32, %c0_i32_0 : i32, i32, i32
  }
}

</mosaic_0001>

<bundles_post_ra>
// kernel: inception_module.1
= control target key start
LH: loop header
LB: loop body
LE: loop exit
PB: predicated region body
PF: predicated region fallthrough
CT: control target
= control target key end

     0   :  { %s4945_s0 = inlined_call_operand.vmem [shape: f32[8,64,1], index: 0, kind: input, shape index: {}]   ;;  %s4946_s1 = inlined_call_operand.vmem [shape: f32[1,32], index: 1, kind: input, shape index: {}]   ;;  %s4947_s2 = inlined_call_operand.vmem [shape: f32[2,256,128], index: 2, kind: input, shape index: {}]   ;;  %s4948_s3 = inlined_call_operand.vmem [shape: f32[1,128], index: 3, kind: input, shape index: {}]   ;;  %s4949_s4 = inlined_call_operand.vmem [shape: f32[1,128], index: 4, kind: input, shape index: {}]   ;;  %s4950_s5 = inlined_call_operand.vmem [shape: f32[128,32], index: 5, kind: input, shape index: {}]   ;;  %s4951_s6 = inlined_call_operand.vmem [shape: f32[2,256,128], index: 6, kind: input, shape index: {}]   ;;  %s4952_s7 = inlined_call_operand.vmem [shape: f32[128,128], index: 7, kind: input, shape index: {}]   ;;  %s4953_s8 = inlined_call_operand.vmem [shape: f32[1,128], index: 8, kind: input, shape index: {}]   ;;  %s4954_s9 = inlined_call_operand.hbm [shape: f32[8,64,128], index: 9, kind: output, shape index: {}]  }
   0x1   :  { %4961 = sst [smem:[#allocation6_spill]] %s4945_s0 }
   0x2   :  { %4962 = sst [smem:[#allocation7_spill]] %s4946_s1 }
   0x3   :  { %14 = vsyncpa [#allocation4], 0 }
   0x4   :  { %16 = vsyncpa [#allocation4 + $0x1], 0  ;;  %s3494_s30 = smov 0   ;;  %s3496_s10 = smov 0  }
   0x5   :  { %s3498_s11 = smov 0   ;;  %s3500_s12 = smov 0  }
   0x6 LB: > { %s3515_s13 = sadd.s32 4294967295, %s3434_s12   ;;  %s2390_s14 = sadd.s32 4294967294, %s3434_s12   ;;  %s3434_s12 = sphi %s3500_s12, %s4973_s12   ;;  %s3430_s11 = sphi %s3498_s11, %s4972_s11   ;;  %s3426_s10 = sphi %s3496_s10, %s4971_s10   ;;  %s3422_s30 = sphi %s3494_s30, %s4970_s30  }
   0x7   : > { %s3519_s15 = sadd.s32 1, %s3434_s12   ;;  %s223_s16 = sadd.s32 1, %s3430_s11 }
   0x8   : > { %s220_s17 = ssub.s32 %s3434_s12, %s3519_s15  ;;  %p233_p0 = scmp.ne.s32.totalorder %s3430_s11, %s3426_s10 }
   0x9   : > { %p221_p1 = scmp.eq.s32.totalorder %s220_s17, 0  ;;  %p234_p2 = scmp.eq.s32.totalorder %s3515_s13, 7 }
   0xa   : > { %p239_p3 = scmp.ne.s32.totalorder %s3426_s10, %s3422_s30  ;;  %p240_p4 = scmp.eq.s32.totalorder %s2390_s14, 7 }
   0xb   : > { %s3530_s18 = scalar_select %p221_p1, %s3430_s11, %s223_s16  }
   0xc   : > { %p3532_p5 = por %p234_p2, %p233_p0  ;;  %p3536_p6 = por %p240_p4, %p239_p3 }
   0xd   : > { %p2393_p7 = scmp.ge.s32.totalorder %s3434_s12, 1  ;;  %p290_p8 = scmp.lt.s32.totalorder %s3434_s12, 9 }
   0xf   : > { %p291_p9 = pnand %p2393_p7, %p290_p8 }
  0x10   : > { %p326_p10 = scmp.lt.s32.totalorder (!%p291_p9), %s3515_s13, 7  ;;  %v3436_v0 = vmov (!%p291_p9), 0   ;;  %s4965_s0 = sld [smem:[#allocation6_spill]] (!%p291_p9)  ;;  %vm333_vm0 = vcmask (!%p291_p9), 261120   ;;  %vm331_vm1 = vcmask (!%p291_p9), 260096   ;;  %v3437_v5 = vmov (!%p291_p9), 0.0  }
  0x11   : > { %294 = sbr.rel (%p291_p9) target bundleno = 1193 (0x4a9), region = 56  ;;  %3071 = vset.pattern.permute.xlu1 (!%p291_p9), %v3436_v0  ;;  %3070 = vset.pattern.permute.xlu0 (!%p291_p9), %v3436_v0  ;;  %332 = vst.msk [vmem:[#allocation2] sm:$0x7f] (!%p291_p9), %vm331_vm1, %v3437_v5  ;;  %v2414_v10 = vld [vmem:[%s4947_s2 + $0x180] sm:$0xff] (!%p291_p9)  ;;  %v2415_v11 = vld [vmem:[%s4947_s2 + $0x188] sm:$0xff] (!%p291_p9)  ;;  %v2416_v21 = vld [vmem:[%s4947_s2 + $0x190] sm:$0xff] (!%p291_p9) }
  0x12   : > { %334 = vst.msk [vmem:[#allocation2 + $0x47] sm:$0xff] (!%p291_p9), %vm333_vm0, %v3437_v5  ;;  %v768_v12 = vld [vmem:[%s4947_s2 + $0x80] sm:$0xff] (!%p291_p9)  ;;  %v2832_v13 = vpack.c.bf16 (!%p291_p9), %v2415_v11, %v2414_v10  ;;  %v769_v14 = vld [vmem:[%s4947_s2 + $0x88] sm:$0xff] (!%p291_p9)  ;;  %v2417_v23 = vld [vmem:[%s4947_s2 + $0x198] sm:$0xff] (!%p291_p9)  ;;  %s4966_s1 = sld [smem:[#allocation7_spill]] (!%p291_p9)  ;;  %vm576_vm2 = vcmask (!%p291_p9), 1042432  }
  0x13   : > { %v2398_v15 = vld [vmem:[%s4947_s2 + $0x100] sm:$0xff] (!%p291_p9)  ;;  %v2399_v16 = vld [vmem:[%s4947_s2 + $0x108] sm:$0xff] (!%p291_p9)  ;;  %v2864_v17 = vpack.c.bf16 (!%p291_p9), %v769_v14, %v768_v12  ;;  %v770_v24 = vld [vmem:[%s4947_s2 + $0x90] sm:$0xff] (!%p291_p9)  ;;  %v2836_v26 = vpack.c.bf16 (!%p291_p9), %v2417_v23, %v2416_v21  ;;  %vm424_vm3 = vcmask (!%p291_p9), 1046528   ;;  %vm618_vm4 = vcmask (!%p291_p9), 1041408   ;;  %s4957_s17 = smov (!%p291_p9), 32  }
  0x14   : > { %v2834_v18 = vpack.c.bf16 (!%p291_p9), %v2399_v16, %v2398_v15  ;;  %v752_v19 = vld [vmem:[%s4947_s2] sm:$0xff] (!%p291_p9)  ;;  %v753_v20 = vld [vmem:[%s4947_s2 + $0x8] sm:$0xff] (!%p291_p9)  ;;  %2833 = vmatprep.subr.bf16.mxu0 (!%p291_p9), %v2832_v13  ;;  %v771_v25 = vld [vmem:[%s4947_s2 + $0x98] sm:$0xff] (!%p291_p9)  ;;  %vm466_vm5 = vcmask (!%p291_p9), 1045504   ;;  %vm660_vm6 = vcmask (!%p291_p9), 1040384   ;;  %vm508_vm7 = vcmask (!%p291_p9), 1044480  }
  0x15   : > { %v2866_v22 = vpack.c.bf16 (!%p291_p9), %v753_v20, %v752_v19  ;;  %2865 = vmatprep.subr.bf16.mxu1 (!%p291_p9), %v2864_v17  ;;  %v2868_v27 = vpack.c.bf16 (!%p291_p9), %v771_v25, %v770_v24  ;;  %v2400_v28 = vld [vmem:[%s4947_s2 + $0x110] sm:$0xff] (!%p291_p9)  ;;  %v2401_v29 = vld [vmem:[%s4947_s2 + $0x118] sm:$0xff] (!%p291_p9)  ;;  %v2418_v33 = vld [vmem:[%s4947_s2 + $0x1a0] sm:$0xff] (!%p291_p9)  ;;  %s4967_s23 = smov (!%p291_p9), 96   ;;  %s4968_s24 = smov (!%p291_p9), 32   ;;  %vm550_vm8 = vcmask (!%p291_p9), 1043456  }
  0x16   : > { %2835 = vmatpush3.bf16.msra.mxu0 (!%p291_p9), %v2834_v18  ;;  %v754_v30 = vld [vmem:[%s4947_s2 + $0x10] sm:$0xff] (!%p291_p9)  ;;  %v2838_v31 = vpack.c.bf16 (!%p291_p9), %v2401_v29, %v2400_v28  ;;  %v755_v32 = vld [vmem:[%s4947_s2 + $0x18] sm:$0xff] (!%p291_p9)  ;;  %v2419_v34 = vld [vmem:[%s4947_s2 + $0x1a8] sm:$0xff] (!%p291_p9)  ;;  %vm710_vm9 = vcmask (!%p291_p9), 523264   ;;  %vm719_vm10 = vcmask (!%p291_p9), 785408  }
  0x17   : > { %2867 = vmatpush3.bf16.msra.mxu1 (!%p291_p9), %v2866_v22  ;;  %2837 = vmatprep.subr.bf16.mxu0 (!%p291_p9), %v2836_v26  ;;  %v2870_v35 = vpack.c.bf16 (!%p291_p9), %v755_v32, %v754_v30  ;;  %v2840_v36 = vpack.c.bf16 (!%p291_p9), %v2419_v34, %v2418_v33  ;;  %v772_v37 = vld [vmem:[%s4947_s2 + $0xa0] sm:$0xff] (!%p291_p9)  ;;  %v773_v38 = vld [vmem:[%s4947_s2 + $0xa8] sm:$0xff] (!%p291_p9)  ;;  %v2420_v45 = vld [vmem:[%s4947_s2 + $0x1b0] sm:$0xff] (!%p291_p9) }
  0x18   : > { %s327_s21 = scalar_select %p326_p10, %s3515_s13, 7  ;;  %2869 = vmatprep.subr.bf16.mxu1 %v2868_v27  ;;  %v2402_v39 = vld [vmem:[%s4947_s2 + $0x120] sm:$0xff]  ;;  %v2872_v40 = vpack.c.bf16 %v773_v38, %v772_v37  ;;  %v2403_v41 = vld [vmem:[%s4947_s2 + $0x128] sm:$0xff]  ;;  %v2421_v46 = vld [vmem:[%s4947_s2 + $0x1b8] sm:$0xff] }
  0x19   : > { %v756_v42 = vld [vmem:[%s4947_s2 + $0x20] sm:$0xff]  ;;  %v757_v43 = vld [vmem:[%s4947_s2 + $0x28] sm:$0xff]  ;;  %v2842_v44 = vpack.c.bf16 %v2403_v41, %v2402_v39  ;;  %v774_v47 = vld [vmem:[%s4947_s2 + $0xb0] sm:$0xff]  ;;  %v2844_v49 = vpack.c.bf16 %v2421_v46, %v2420_v45 }
  0x1a   : > { %s2470_s22 = sshll.u32 %s327_s21, 6  ;;  %2839 = vmatpush3.bf16.msra.mxu0 %v2838_v31  ;;  %v2874_v48 = vpack.c.bf16 %v757_v43, %v756_v42  ;;  %v775_v50 = vld [vmem:[%s4947_s2 + $0xb8] sm:$0xff]  ;;  %v2404_v51 = vld [vmem:[%s4947_s2 + $0x130] sm:$0xff]  ;;  %v2422_v56 = vld [vmem:[%s4947_s2 + $0x1c0] sm:$0xff]  ;;  %s4955_s21 = smov 64  }
  0x1b   : > { %s330_s25 = scalar_lea.vmem %s4965_s0, %s2470_s22  ;;  %2871 = vmatpush3.bf16.msra.mxu1 %v2870_v35  ;;  %2841 = vmatprep.subr.bf16.mxu0 %v2840_v36  ;;  %v2405_v52 = vld [vmem:[%s4947_s2 + $0x138] sm:$0xff]  ;;  %v2876_v53 = vpack.c.bf16 %v775_v50, %v774_v47  ;;  %v758_v54 = vld [vmem:[%s4947_s2 + $0x30] sm:$0xff]  ;;  %v2423_v57 = vld [vmem:[%s4947_s2 + $0x1c8] sm:$0xff]  ;;  %s4959_s22 = smov 96  }
  0x1c   : > { %v3547_v1 = vld [vmem:[%s330_s25 + $0x10] sm:$0xff]  ;;  %v3549_v2 = vld [vmem:[%s330_s25] sm:$0xff]  ;;  %v3553_v3 = vld [vmem:[%s330_s25 + $0x18] sm:$0xff]  ;;  %2873 = vmatprep.subr.bf16.mxu1 %v2872_v40  ;;  %v2846_v60 = vpack.c.bf16 %v2405_v52, %v2404_v51  ;;  %v2848_v62 = vpack.c.bf16 %v2423_v57, %v2422_v56  ;;  %s2471_s0 = sshll.u32 %s3515_s13, 10 }
  0x1d   : > { %356 = vperm.xlu1 %3071, %v3547_v1   ;;  %346 = vperm.xlu0 %3070, %v3549_v2   ;;  %v3555_v4 = vld [vmem:[%s330_s25 + $0x8] sm:$0xff]  ;;  %v3562_v7 = vld [vmem:[%s330_s25 + $0x20] sm:$0xff]  ;;  %v3566_v8 = vld [vmem:[%s330_s25 + $0x38] sm:$0xff]  ;;  %s4896_s14 = scalar_lea.hbm %s4954_s9, %s2471_s0 }
  0x1e   : > { %v3560_v6 = vld [vmem:[%s330_s25 + $0x28] sm:$0xff]  ;;  %v3568_v9 = vld [vmem:[%s330_s25 + $0x30] sm:$0xff]  ;;  %v759_v55 = vld [vmem:[%s4947_s2 + $0x38] sm:$0xff]  ;;  %2843 = vmatpush3.bf16.msra.mxu0 %v2842_v44  ;;  %s3441_s25 = smov [#allocation3]  }
  0x1f   : > { %v776_v58 = vld [vmem:[%s4947_s2 + $0xc0] sm:$0xff]  ;;  %v777_v59 = vld [vmem:[%s4947_s2 + $0xc8] sm:$0xff]  ;;  %2875 = vmatpush3.bf16.msra.mxu1 %v2874_v48  ;;  %2845 = vmatprep.subr.bf16.mxu0 %v2844_v49  ;;  %v2878_v61 = vpack.c.bf16 %v759_v55, %v758_v54  ;;  %v2424_v23 = vld [vmem:[%s4947_s2 + $0x1d0] sm:$0xff] }
  0x20   : > { %v2406_v63 = vld [vmem:[%s4947_s2 + $0x140] sm:$0xff]  ;;  %v2407_v0 = vld [vmem:[%s4947_s2 + $0x148] sm:$0xff]  ;;  %2877 = vmatprep.subr.bf16.mxu1 %v2876_v53  ;;  %v2880_v5 = vpack.c.bf16 %v777_v59, %v776_v58  ;;  %v2425_v24 = vld [vmem:[%s4947_s2 + $0x1d8] sm:$0xff] }
  0x21   : > { %361 = vperm.xlu1 %3071, %v3553_v3   ;;  %351 = vperm.xlu0 %3070, %v3555_v4   ;;  %v760_v10 = vld [vmem:[%s4947_s2 + $0x40] sm:$0xff]  ;;  %v761_v11 = vld [vmem:[%s4947_s2 + $0x48] sm:$0xff]  ;;  %v2850_v12 = vpack.c.bf16 %v2407_v0, %v2406_v63  ;;  %v778_v25 = vld [vmem:[%s4947_s2 + $0xd0] sm:$0xff]  ;;  %v2852_v28 = vpack.c.bf16 %v2425_v24, %v2424_v23 }
  0x22   : > { %2847 = vmatpush3.bf16.msra.mxu0 %v2846_v60  ;;  %v2882_v13 = vpack.c.bf16 %v761_v11, %v760_v10  ;;  %v2397_v14 = vld [vmem:[%s4966_s1] ss:$0 sm:$0xff]  ;;  %v779_v29 = vld [vmem:[%s4947_s2 + $0xd8] sm:$0xff]  ;;  %v2408_v30 = vld [vmem:[%s4947_s2 + $0x150] sm:$0xff]  ;;  %s3376_s1 = sshll.u32 %s3441_s25, 4  ;;  %s3377_s1 = int_to_ptr.vmem [resolvable:$false] %s3376_s1 }
  0x23   : > { %2879 = vmatpush3.bf16.msra.mxu1 %v2878_v61  ;;  %2849 = vmatprep.subr.bf16.mxu0 %v2848_v62  ;;  %v2409_v31 = vld [vmem:[%s4947_s2 + $0x158] sm:$0xff]  ;;  %v2884_v34 = vpack.c.bf16 %v779_v29, %v778_v25  ;;  %v762_v36 = vld [vmem:[%s4947_s2 + $0x50] sm:$0xff]  ;;  %v2426_v40 = vld [vmem:[%s4947_s2 + $0x1e0] sm:$0xff]  ;;  %s3378_s26 = scalar_lea.vmem %s3377_s1, 2048 }
  0x24   : > { %2881 = vmatprep.subr.bf16.mxu1 %v2880_v5  ;;  %v2854_v35 = vpack.c.bf16 %v2409_v31, %v2408_v30  ;;  %v763_v37 = vld [vmem:[%s4947_s2 + $0x58] sm:$0xff]  ;;  %v2427_v41 = vld [vmem:[%s4947_s2 + $0x1e8] sm:$0xff]  ;;  %v780_v48 = vld [vmem:[%s4947_s2 + $0xe0] sm:$0xff] }
  0x25   : > { %371 = vperm.xlu1 %3071, %v3560_v6   ;;  %366 = vperm.xlu0 %3070, %v3562_v7   ;;  %v2886_v39 = vpack.c.bf16 %v763_v37, %v762_v36  ;;  %v2856_v47 = vpack.c.bf16 %v2427_v41, %v2426_v40  ;;  %v781_v49 = vld [vmem:[%s4947_s2 + $0xe8] sm:$0xff]  ;;  %v2410_v50 = vld [vmem:[%s4947_s2 + $0x160] sm:$0xff] }
  0x26   : > { %2851 = vmatpush3.bf16.msra.mxu0 %v2850_v12  ;;  %v2888_v54 = vpack.c.bf16 %v781_v49, %v780_v48  ;;  %v2411_v55 = vld [vmem:[%s4947_s2 + $0x168] sm:$0xff]  ;;  %v764_v56 = vld [vmem:[%s4947_s2 + $0x60] sm:$0xff] }
  0x27   : > { %2883 = vmatpush3.bf16.msra.mxu1 %v2882_v13  ;;  %2853 = vmatprep.subr.bf16.mxu0 %v2852_v28  ;;  %v765_v57 = vld [vmem:[%s4947_s2 + $0x68] sm:$0xff]  ;;  %v2858_v62 = vpack.c.bf16 %v2411_v55, %v2410_v50 }
  0x28   : > { %2885 = vmatprep.subr.bf16.mxu1 %v2884_v34  ;;  %v2890_v63 = vpack.c.bf16 %v765_v57, %v764_v56 }
  0x29   : > { %381 = vperm.xlu1 %3071, %v3566_v8   ;;  %376 = vperm.xlu0 %3070, %v3568_v9  }
  0x2a   : > { %2855 = vmatpush3.bf16.msra.mxu0 %v2854_v35 }
  0x2b   : > { %2887 = vmatpush3.bf16.msra.mxu1 %v2886_v39  ;;  %2857 = vmatprep.subr.bf16.mxu0 %v2856_v47 }
  0x2c   : > { %2889 = vmatprep.subr.bf16.mxu1 %v2888_v54 }
  0x2e   : > { %2859 = vmatpush3.bf16.msra.mxu0 %v2858_v62 }
  0x2f   : > { %2891 = vmatpush3.bf16.msra.mxu1 %v2890_v63 }
  0x9c   : > { %v357_v15 = vpop.permute.xlu1 %356  ;;  %v347_v16 = vpop.permute.xlu0 %346 }
  0x9d   : > { %v392_v17 = vmul.f32 %v2397_v14, %v357_v15  ;;  %v390_v18 = vmul.f32 %v2397_v14, %v347_v16 }
  0x9f   : > { %400 = vst.msk [vmem:[#allocation2 + $0x17] sm:$0xff] %vm333_vm0, %v392_v17  ;;  %398 = vst.msk [vmem:[#allocation2 + $0x7] sm:$0xff] %vm333_vm0, %v390_v18 }
  0xa0   : > { %v362_v19 = vpop.permute.xlu1 %361  ;;  %v352_v20 = vpop.permute.xlu0 %351 }
  0xa1   : > { %v393_v21 = vmul.f32 %v2397_v14, %v362_v19  ;;  %v391_v22 = vmul.f32 %v2397_v14, %v352_v20 }
  0xa3   : > { %401 = vst.msk [vmem:[#allocation2 + $0x1f] sm:$0xff] %vm333_vm0, %v393_v21  ;;  %399 = vst.msk [vmem:[#allocation2 + $0xf] sm:$0xff] %vm333_vm0, %v391_v22 }
  0xa4   : > { %v372_v26 = vpop.permute.xlu1 %371  ;;  %v367_v27 = vpop.permute.xlu0 %366 }
  0xa5   : > { %v395_v32 = vmul.f32 %v2397_v14, %v372_v26  ;;  %v394_v33 = vmul.f32 %v2397_v14, %v367_v27 }
  0xa6   : > { %v3723_v38 = vld [vmem:[#allocation2] sm:$0xff] }
  0xa7   : > { %403 = vst.msk [vmem:[#allocation2 + $0x2f] sm:$0xff] %vm333_vm0, %v395_v32  ;;  %402 = vst.msk [vmem:[#allocation2 + $0x27] sm:$0xff] %vm333_vm0, %v394_v33  ;;  %v577_v44 = vrot.slane %v3723_v38, 5  ;;  %v425_v45 = vrot.slane %v3723_v38, 1  ;;  %v619_v46 = vrot.slane %v3723_v38, 6  ;;  %v467_v53 = vrot.slane %v3723_v38, 2 }
  0xa8   : > { %v382_v42 = vpop.permute.xlu1 %381  ;;  %v377_v43 = vpop.permute.xlu0 %376  ;;  %v661_v60 = vrot.slane %v3723_v38, 7  ;;  %v509_v61 = vrot.slane %v3723_v38, 3 }
  0xa9   : > { %v397_v51 = vmul.f32 %v2397_v14, %v382_v42  ;;  %v396_v52 = vmul.f32 %v2397_v14, %v377_v43 }
  0xaa   : > { %v3755_v58 = vld [vmem:[#allocation2 + $0x8] sm:$0xff]  ;;  %v3757_v59 = vld [vmem:[#allocation2 + $0x10] sm:$0xff]  ;;  %v3777_v24 = vld [vmem:[#allocation2 + $0x18] sm:$0xff] }
  0xab   : > { %405 = vst.msk [vmem:[#allocation2 + $0x3f] sm:$0xff] %vm333_vm0, %v397_v51  ;;  %404 = vst.msk [vmem:[#allocation2 + $0x37] sm:$0xff] %vm333_vm0, %v396_v52  ;;  %v578_v0 = vrot.slane %v3755_v58, 5  ;;  %v580_v5 = vrot.slane %v3757_v59, 5  ;;  %v426_v10 = vrot.slane %v3755_v58, 1  ;;  %v428_v11 = vrot.slane %v3757_v59, 1 }
  0xac   : > { %v620_v12 = vrot.slane %v3755_v58, 6  ;;  %v622_v13 = vrot.slane %v3757_v59, 6  ;;  %v468_v14 = vrot.slane %v3755_v58, 2  ;;  %v470_v15 = vrot.slane %v3757_v59, 2 }
  0xad   : > { %v579_v16 = vsel %vm576_vm2, %v577_v44, %v578_v0  ;;  %v581_v17 = vsel %vm576_vm2, %v578_v0, %v580_v5  ;;  %v427_v18 = vsel %vm424_vm3, %v425_v45, %v426_v10  ;;  %v429_v19 = vsel %vm424_vm3, %v426_v10, %v428_v11 }
  0xae   : > { %v3072_v20 = vpack.i.bf16 %v581_v17, %v579_v16  ;;  %v3077_v21 = vpack.i.bf16 %v429_v19, %v427_v18  ;;  %v621_v22 = vsel %vm618_vm4, %v619_v46, %v620_v12  ;;  %v623_v23 = vsel %vm618_vm4, %v620_v12, %v622_v13  ;;  %v3795_v42 = vld [vmem:[#allocation2 + $0x20] sm:$0xff] }
  0xaf   : > { %v3082_v25 = vpack.i.bf16 %v623_v23, %v621_v22  ;;  %v469_v26 = vsel %vm466_vm5, %v467_v53, %v468_v14  ;;  %v471_v27 = vsel %vm466_vm5, %v468_v14, %v470_v15  ;;  %v662_v28 = vrot.slane %v3755_v58, 7 }
  0xb0   : > { %3073 = vrot.lane.b32.xlu0 %v3072_v20, %s4957_s17  ;;  %3078 = vrot.lane.b32.xlu1 %v3077_v21, %s4957_s17  ;;  %v3087_v29 = vpack.i.bf16 %v471_v27, %v469_v26  ;;  %v664_v30 = vrot.slane %v3757_v59, 7  ;;  %v510_v31 = vrot.slane %v3755_v58, 3  ;;  %v512_v32 = vrot.slane %v3757_v59, 3 }
  0xb1   : > { %v663_v33 = vsel %vm660_vm6, %v661_v60, %v662_v28  ;;  %v430_v34 = vrot.slane %v3777_v24, 1  ;;  %v582_v35 = vrot.slane %v3777_v24, 5  ;;  %v472_v36 = vrot.slane %v3777_v24, 2 }
  0xb2   : > { %v665_v37 = vsel %vm660_vm6, %v662_v28, %v664_v30  ;;  %v511_v39 = vsel %vm508_vm7, %v509_v61, %v510_v31  ;;  %v513_v40 = vsel %vm508_vm7, %v510_v31, %v512_v32  ;;  %v624_v41 = vrot.slane %v3777_v24, 6  ;;  %v3825_v16 = vld [vmem:[#allocation2 + $0x30] sm:$0xff] }
  0xb3   : > { %v3092_v43 = vpack.i.bf16 %v665_v37, %v663_v33  ;;  %v3097_v44 = vpack.i.bf16 %v513_v40, %v511_v39  ;;  %v431_v45 = vsel %vm424_vm3, %v428_v11, %v430_v34  ;;  %v583_v46 = vsel %vm576_vm2, %v580_v5, %v582_v35  ;;  %v3817_v5 = vld [vmem:[#allocation2 + $0x28] sm:$0xff]  ;;  %v3849_v39 = vld [vmem:[#allocation2 + $0x38] sm:$0xff] }
  0xb4   : > { %3083 = vrot.lane.b32.xlu0 %v3082_v25, %s4955_s21  ;;  %3088 = vrot.lane.b32.xlu1 %v3087_v29, %s4955_s21  ;;  %v473_v47 = vsel %vm466_vm5, %v470_v15, %v472_v36  ;;  %v514_v48 = vrot.slane %v3777_v24, 3  ;;  %v625_v49 = vsel %vm618_vm4, %v622_v13, %v624_v41  ;;  %v666_v50 = vrot.slane %v3777_v24, 7 }
  0xb5   : > { %v432_v51 = vrot.slane %v3795_v42, 1  ;;  %v584_v52 = vrot.slane %v3795_v42, 5  ;;  %v3102_v53 = vpack.i.bf16 %v431_v45, %v583_v46  ;;  %v3107_v54 = vpack.i.bf16 %v473_v47, %v625_v49 }
  0xb6   : > { %v515_v55 = vsel %vm508_vm7, %v512_v32, %v514_v48  ;;  %v474_v56 = vrot.slane %v3795_v42, 2  ;;  %v626_v57 = vrot.slane %v3795_v42, 6  ;;  %v667_v60 = vsel %vm660_vm6, %v664_v30, %v666_v50 }
  0xb7   : > { %v433_v61 = vsel %vm424_vm3, %v430_v34, %v432_v51  ;;  %v585_v62 = vsel %vm576_vm2, %v582_v35, %v584_v52  ;;  %v516_v63 = vrot.slane %v3795_v42, 3  ;;  %v668_v0 = vrot.slane %v3795_v42, 7 }
  0xb8   : > { %3093 = vrot.lane.b32.xlu0 %v3092_v43, %s4959_s22  ;;  %3098 = vrot.lane.b32.xlu1 %v3097_v44, %s4959_s22  ;;  %v3112_v10 = vpack.i.bf16 %v515_v55, %v667_v60  ;;  %v3117_v11 = vpack.i.bf16 %v433_v61, %v585_v62  ;;  %v475_v12 = vsel %vm466_vm5, %v472_v36, %v474_v56  ;;  %v434_v15 = vrot.slane %v3817_v5, 1  ;;  %v2428_v55 = vld [vmem:[%s4947_s2 + $0x1f0] sm:$0xff]  ;;  %v783_v60 = vld [vmem:[%s4947_s2 + $0xf8] sm:$0xff] }
  0xb9   : > { %v627_v13 = vsel %vm618_vm4, %v624_v41, %v626_v57  ;;  %v517_v14 = vsel %vm508_vm7, %v514_v48, %v516_v63  ;;  %v669_v17 = vsel %vm660_vm6, %v666_v50, %v668_v0  ;;  %v586_v18 = vrot.slane %v3817_v5, 5  ;;  %v2412_v61 = vld [vmem:[%s4947_s2 + $0x170] sm:$0xff]  ;;  %v2413_v62 = vld [vmem:[%s4947_s2 + $0x178] sm:$0xff] }
  0xba   : > { %v476_v19 = vrot.slane %v3817_v5, 2  ;;  %v628_v20 = vrot.slane %v3817_v5, 6  ;;  %v518_v21 = vrot.slane %v3817_v5, 3  ;;  %v670_v22 = vrot.slane %v3817_v5, 7 }
  0xbb   : > { %v436_v23 = vrot.slane %v3825_v16, 1  ;;  %v588_v25 = vrot.slane %v3825_v16, 5  ;;  %v3122_v26 = vpack.i.bf16 %v475_v12, %v627_v13  ;;  %v3127_v27 = vpack.i.bf16 %v517_v14, %v669_v17  ;;  %v767_v12 = vld [vmem:[%s4947_s2 + $0x78] sm:$0xff] }
  0xbc   : > { %3103 = vrot.lane.b32.xlu0 %v3102_v53, %s4957_s17  ;;  %3108 = vrot.lane.b32.xlu1 %v3107_v54, %s4955_s21  ;;  %v435_v28 = vsel %vm424_vm3, %v432_v51, %v434_v15  ;;  %v587_v29 = vsel %vm576_vm2, %v584_v52, %v586_v18  ;;  %v477_v30 = vsel %vm466_vm5, %v474_v56, %v476_v19  ;;  %v478_v36 = vrot.slane %v3825_v16, 2  ;;  %v2429_v56 = vld [vmem:[%s4947_s2 + $0x1f8] sm:$0xff] }
  0xbd   : > { %v629_v31 = vsel %vm618_vm4, %v626_v57, %v628_v20  ;;  %v519_v32 = vsel %vm508_vm7, %v516_v63, %v518_v21  ;;  %v671_v33 = vsel %vm660_vm6, %v668_v0, %v670_v22  ;;  %v437_v34 = vsel %vm424_vm3, %v434_v15, %v436_v23  ;;  %v782_v57 = vld [vmem:[%s4947_s2 + $0xf0] sm:$0xff] }
  0xbe   : > { %v589_v35 = vsel %vm576_vm2, %v586_v18, %v588_v25  ;;  %v630_v37 = vrot.slane %v3825_v16, 6  ;;  %v3132_v40 = vpack.i.bf16 %v435_v28, %v587_v29  ;;  %v3137_v41 = vpack.i.bf16 %v477_v30, %v629_v31 }
  0xbf   : > { %v520_v43 = vrot.slane %v3825_v16, 3  ;;  %v672_v44 = vrot.slane %v3825_v16, 7  ;;  %v3142_v45 = vpack.i.bf16 %v519_v32, %v671_v33  ;;  %v3147_v46 = vpack.i.bf16 %v437_v34, %v589_v35  ;;  %v3922_v33 = vld [vmem:[#allocation2 + $0x48] sm:$0x7f] }
  0xc0   : > { %3113 = vrot.lane.b32.xlu0 %v3112_v10, %s4959_s22  ;;  %3118 = vrot.lane.b32.xlu1 %v3117_v11, %s4957_s17  ;;  %v479_v47 = vsel %vm466_vm5, %v476_v19, %v478_v36  ;;  %v631_v48 = vsel %vm618_vm4, %v628_v20, %v630_v37  ;;  %v3858_v49 = vrot.slane %v3849_v39, 1  ;;  %v3861_v50 = vrot.slane %v3849_v39, 5  ;;  %v3894_v10 = vld [vmem:[#allocation2 + $0x40] sm:$0xff]  ;;  %v766_v11 = vld [vmem:[%s4947_s2 + $0x70] sm:$0xff] }
  0xc1   : > { %v521_v51 = vsel %vm508_vm7, %v518_v21, %v520_v43  ;;  %v673_v52 = vsel %vm660_vm6, %v670_v22, %v672_v44  ;;  %v3866_v53 = vrot.slane %v3849_v39, 2  ;;  %v3869_v54 = vrot.slane %v3849_v39, 6 }
  0xc2   : > { %v3152_v63 = vpack.i.bf16 %v479_v47, %v631_v48  ;;  %v3892_v0 = vrot.slane %v3849_v39, 3  ;;  %v3157_v13 = vpack.i.bf16 %v521_v51, %v673_v52  ;;  %v439_v14 = vsel %vm424_vm3, %v436_v23, %v3858_v49 }
  0xc3   : > { %v591_v15 = vsel %vm576_vm2, %v588_v25, %v3861_v50  ;;  %v2860_v17 = vpack.c.bf16 %v2429_v56, %v2428_v55  ;;  %v481_v18 = vsel %vm466_vm5, %v478_v36, %v3866_v53  ;;  %v633_v19 = vsel %vm618_vm4, %v630_v37, %v3869_v54 }
  0xc4   : > { %3123 = vrot.lane.b32.xlu0 %v3122_v26, %s4955_s21  ;;  %3128 = vrot.lane.b32.xlu1 %v3127_v27, %s4959_s22  ;;  %v3911_v20 = vrot.slane %v3849_v39, 7  ;;  %v2892_v21 = vpack.c.bf16 %v783_v60, %v782_v57  ;;  %v788_v22 = vrot.slane %v3894_v10, 1  ;;  %v824_v26 = vrot.slane %v3894_v10, 5 }
  0xc5   : > { %2861 = vmatprep.subr.bf16.mxu0 %v2860_v17  ;;  %v2862_v23 = vpack.c.bf16 %v2413_v62, %v2412_v61  ;;  %v2894_v27 = vpack.c.bf16 %v767_v12, %v766_v11  ;;  %v3162_v25 = vpack.i.bf16 %v439_v14, %v591_v15  ;;  %v3167_v28 = vpack.i.bf16 %v481_v18, %v633_v19 }
  0xc6   : > { %2893 = vmatprep.subr.bf16.mxu1 %v2892_v21  ;;  %v523_v29 = vsel %vm508_vm7, %v520_v43, %v3892_v0  ;;  %v798_v30 = vrot.slane %v3894_v10, 2  ;;  %v834_v31 = vrot.slane %v3894_v10, 6  ;;  %v808_v32 = vrot.slane %v3894_v10, 3 }
  0xc7   : > { %2863 = vmatpush3.bf16.msra.mxu0 %v2862_v23  ;;  %2895 = vmatpush3.bf16.msra.mxu1 %v2894_v27  ;;  %v675_v34 = vsel %vm660_vm6, %v672_v44, %v3911_v20  ;;  %v789_v35 = vsel %vm424_vm3, %v3858_v49, %v788_v22  ;;  %v825_v36 = vsel %vm576_vm2, %v3861_v50, %v824_v26  ;;  %v844_v37 = vrot.slane %v3894_v10, 7 }
  0xc8   : > { %3133 = vrot.lane.b32.xlu0 %v3132_v40, %s4957_s17  ;;  %3138 = vrot.lane.b32.xlu1 %v3137_v41, %s4955_s21  ;;  %s4969_s17 = smov 64   ;;  %v3931_v40 = vld [vmem:[#allocation2 + $0x40] sm:$0x7f]  ;;  %v826_v41 = vrot.slane %v3922_v33, 5  ;;  %v790_v43 = vrot.slane %v3922_v33, 1  ;;  %v3177_v44 = vpack.i.bf16 %v789_v35, %v825_v36  ;;  %v835_v48 = vsel %vm618_vm4, %v3869_v54, %v834_v31 }
  0xc9   : > { %v592_v47 = vrot.slane %v3931_v40, 5  ;;  %v809_v51 = vsel %vm508_vm7, %v3892_v0, %v808_v32  ;;  %v845_v52 = vsel %vm660_vm6, %v3911_v20, %v844_v37  ;;  %v440_v55 = vrot.slane %v3931_v40, 1 }
  0xca   : > { %v836_v56 = vrot.slane %v3922_v33, 6  ;;  %v800_v57 = vrot.slane %v3922_v33, 2  ;;  %v1109_v60 = vrot.slane %v3549_v2, 7  ;;  %v3187_v62 = vpack.i.bf16 %v809_v51, %v845_v52 }
  0xcb   : > { %v827_v11 = vsel %vm576_vm2, %v824_v26, %v826_v41  ;;  %v441_v12 = vsel %vm424_vm3, %v3858_v49, %v440_v55  ;;  %v634_v14 = vrot.slane %v3931_v40, 6  ;;  %v482_v15 = vrot.slane %v3931_v40, 2 }
  0xcc   : > { %3143 = vrot.lane.b32.xlu0 %v3142_v45, %s4967_s23  ;;  %3148 = vrot.lane.b32.xlu1 %v3147_v46, %s4968_s24  ;;  %v3172_v45 = vpack.i.bf16 %v523_v29, %v675_v34  ;;  %v799_v46 = vsel %vm466_vm5, %v3866_v53, %v798_v30  ;;  %v1110_v17 = vrot.slane %v3555_v4, 7  ;;  %v846_v18 = vrot.slane %v3922_v33, 7 }
  0xcd   : > { %v3182_v61 = vpack.i.bf16 %v799_v46, %v835_v48  ;;  %v1132_v19 = vsel %vm660_vm6, %v3549_v2, %v1109_v60  ;;  %v801_v26 = vsel %vm466_vm5, %v798_v30, %v800_v57  ;;  %v635_v23 = vsel %vm618_vm4, %v3869_v54, %v634_v14 }
  0xce   : > { %v483_v27 = vsel %vm466_vm5, %v3866_v53, %v482_v15  ;;  %v1112_v29 = vrot.slane %v3547_v1, 7  ;;  %v1134_v34 = vrot.slane %v3555_v4, 1  ;;  %v1133_v30 = vrot.slane %v3549_v2, 1 }
  0xcf   : > { %v1114_v54 = vrot.slane %v3553_v3, 7  ;;  %v1111_v53 = vsel %vm660_vm6, %v1109_v60, %v1110_v17  ;;  %v1138_v35 = vrot.slane %v3553_v3, 1  ;;  %v3207_v41 = vpack.i.bf16 %v801_v26, %v483_v27 }
  0xd0   : > { %3153 = vrot.lane.b32.xlu0 %v3152_v63, %s4969_s17  ;;  %3158 = vrot.lane.b32.xlu1 %v3157_v13, %s4967_s23  ;;  %v593_v63 = vsel %vm576_vm2, %v3861_v50, %v592_v47  ;;  %v791_v13 = vsel %vm424_vm3, %v788_v22, %v790_v43  ;;  %v810_v50 = vrot.slane %v3922_v33, 3  ;;  %v837_v22 = vsel %vm618_vm4, %v834_v31, %v836_v56 }
  0xd1   : > { %v3192_v49 = vpack.i.bf16 %v827_v11, %v593_v63  ;;  %v3197_v21 = vpack.i.bf16 %v791_v13, %v441_v12  ;;  %v1136_v31 = vrot.slane %v3547_v1, 1  ;;  %v3202_v36 = vpack.i.bf16 %v837_v22, %v635_v23 }
  0xd2   : > { %v1157_v43 = vmax.f32 %v1132_v19, %v3549_v2  ;;  %v811_v47 = vsel %vm508_vm7, %v808_v32, %v810_v50  ;;  %v1116_v48 = vrot.slane %v3562_v7, 7  ;;  %v1135_v2 = vsel %vm424_vm3, %v1133_v30, %v1134_v34  ;;  %v1259_v30 = vld [vmem:[%s4950_s5] sm:$0xff] }
  0xd3   : > { %v1158_v51 = vmax.f32 %v1111_v53, %v3555_v4  ;;  %v1137_v52 = vsel %vm424_vm3, %v1134_v34, %v1136_v31  ;;  %v1115_v32 = vsel %vm660_vm6, %v1112_v29, %v1114_v54  ;;  %v1142_v57 = vrot.slane %v3560_v6, 1 }
  0xd4   : > { %3163 = vrot.lane.b32.xlu0 %v3162_v25, %s4968_s24  ;;  %3168 = vrot.lane.b32.xlu1 %v3167_v28, %s4969_s17  ;;  %v676_v25 = vrot.slane %v3931_v40, 7  ;;  %v524_v28 = vrot.slane %v3931_v40, 3  ;;  %v1165_v60 = vmax.f32 %v1157_v43, %v1135_v2  ;;  %v1120_v4 = vrot.slane %v3568_v9, 7 }
  0xd5   : > { %v1166_v63 = vmax.f32 %v1158_v51, %v1137_v52  ;;  %v1160_v11 = vmax.f32 %v1115_v32, %v3553_v3  ;;  %v1117_v12 = vsel %vm660_vm6, %v1114_v54, %v1116_v48  ;;  %v1144_v13 = vrot.slane %v3568_v9, 1 }
  0xd6   : > { %v525_v46 = vsel %vm508_vm7, %v3892_v0, %v524_v28  ;;  %v1140_v0 = vrot.slane %v3562_v7, 1  ;;  %v1146_v22 = vrot.slane %v3566_v8, 1  ;;  %v551_v2 = vrot.slane %v3723_v38, 4 }
  0xd7   : > { %v3217_v56 = vpack.i.bf16 %v811_v47, %v525_v46  ;;  %v1261_v47 = vld [vmem:[%s4950_s5 + $0x10] sm:$0xff] }
  0xd8   : > { %3173 = vrot.lane.b32.xlu0 %v3172_v45, %s4967_s23  ;;  %3178 = vrot.lane.b32.xlu1 %v3177_v44, %s4968_s24  ;;  %v677_v45 = vsel %vm660_vm6, %v3911_v20, %v676_v25  ;;  %v847_v44 = vsel %vm660_vm6, %v844_v37, %v846_v18  ;;  %v1113_v20 = vsel %vm660_vm6, %v1110_v17, %v1112_v29  ;;  %v1118_v37 = vrot.slane %v3560_v6, 7 }
  0xd9   : > { %v3212_v55 = vpack.i.bf16 %v847_v44, %v677_v45  ;;  %v1141_v14 = vsel %vm424_vm3, %v1138_v35, %v1140_v0  ;;  %v1122_v17 = vrot.slane %v3566_v8, 7  ;;  %v1161_v18 = vmax.f32 %v1117_v12, %v3562_v7 }
  0xda   : > { %v1119_v15 = vsel %vm660_vm6, %v1116_v48, %v1118_v37  ;;  %v1168_v50 = vmax.f32 %v1160_v11, %v1141_v14  ;;  %v1143_v19 = vsel %vm424_vm3, %v1140_v0, %v1142_v57  ;;  %v1147_v28 = vsel %vm424_vm3, %v1144_v13, %v1146_v22  ;;  %v1262_v48 = vld [vmem:[%s4950_s5 + $0x18] sm:$0xff] }
  0xdb   : > { %v1162_v3 = vmax.f32 %v1119_v15, %v3560_v6  ;;  %v1123_v26 = vsel %vm660_vm6, %v1120_v4, %v1122_v17  ;;  %v1169_v23 = vmax.f32 %v1161_v18, %v1143_v19  ;;  %v1156_v6 = vsel %vm424_vm3, %v1146_v22, %v3566_v8  ;;  %v1264_v22 = vld [vmem:[%s4950_s5 + $0x28] sm:$0xff] }
  0xdc   : > { %3183 = vrot.lane.b32.xlu0 %v3182_v61, %s4969_s17  ;;  %3188 = vrot.lane.b32.xlu1 %v3187_v62, %s4967_s23  ;;  %v1139_v61 = vsel %vm424_vm3, %v1136_v31, %v1138_v35  ;;  %v1159_v62 = vmax.f32 %v1113_v20, %v3547_v1  ;;  %v1164_v25 = vmax.f32 %v1123_v26, %v3566_v8  ;;  %v552_v8 = vrot.slane %v3755_v58, 4 }
  0xdd   : > { %v554_v35 = vrot.slane %v3757_v59, 4 }
  0xde   : > { %v1167_v1 = vmax.f32 %v1159_v62, %v1139_v61  ;;  %v1172_v34 = vmax.f32 %v1164_v25, %v1156_v6  ;;  %v553_v32 = vsel %vm550_vm8, %v551_v2, %v552_v8 }
  0xdf   : > { %v555_v52 = vsel %vm550_vm8, %v552_v8, %v554_v35 }
  0xe0   : > { %3193 = vrot.lane.b32.xlu0 %v3192_v49, %s4968_s24  ;;  %3198 = vrot.lane.b32.xlu1 %v3197_v21, %s4968_s24  ;;  %v1145_v49 = vsel %vm424_vm3, %v1142_v57, %v1144_v13  ;;  %v1121_v21 = vsel %vm660_vm6, %v1118_v37, %v1120_v4 }
  0xe1   : > { %v1170_v27 = vmax.f32 %v1162_v3, %v1145_v49  ;;  %v1163_v7 = vmax.f32 %v1121_v21, %v3568_v9  ;;  %v1260_v9 = vld [vmem:[%s4950_s5 + $0x8] sm:$0xff]  ;;  %v1263_v21 = vld [vmem:[%s4950_s5 + $0x20] sm:$0xff] }
  0xe2   : > { %v2896_v31 = vpack.c.bf16 %v1260_v9, %v1259_v30  ;;  %v558_v9 = vrot.slane %v3795_v42, 4 }
  0xe3   : > { %v1171_v29 = vmax.f32 %v1163_v7, %v1147_v28 }
  0xe4   : > { %3203 = vrot.lane.b32.xlu0 %v3202_v36, %s4969_s17  ;;  %3208 = vrot.lane.b32.xlu1 %v3207_v41, %s4969_s17 }
  0xe5   : > { %2897 = vmatprep.subr.bf16.mxu0 %v2896_v31 }
  0xe8   : > { %3213 = vrot.lane.b32.xlu0 %v3212_v55, %s4967_s23  ;;  %3218 = vrot.lane.b32.xlu1 %v3217_v56, %s4967_s23  ;;  %v556_v55 = vrot.slane %v3777_v24, 4  ;;  %v2900_v56 = vpack.c.bf16 %v1262_v48, %v1261_v47 }
  0xea   : > { %v557_v25 = vsel %vm550_vm8, %v554_v35, %v556_v55 }
  0xec   : > { %1176 = vperm.xlu0 %3070, %v1165_v60   ;;  %1181 = vperm.xlu1 %3071, %v1166_v63  }
  0xf0   : > { %1186 = vperm.xlu0 %3070, %v1167_v1   ;;  %1191 = vperm.xlu1 %3071, %v1168_v50  }
  0xf4   : > { %1196 = vperm.xlu0 %3070, %v1169_v23   ;;  %1201 = vperm.xlu1 %3071, %v1170_v27  }
  0xf8   : > { %1206 = vperm.xlu0 %3070, %v1171_v29   ;;  %1211 = vperm.xlu1 %3071, %v1172_v34   ;;  %v2904_v29 = vpack.c.bf16 %v1264_v22, %v1263_v21 }
 0x122   : > { %v3079_v54 = vpop.permute.xlu1 %3078  ;;  %v3074_v53 = vpop.permute.xlu0 %3073 }
 0x123   : > { %v3081_v36 = vunpack.i.h.bf16 %v3079_v54  ;;  %v3080_v41 = vunpack.i.l.bf16 %v3079_v54  ;;  %v3076_v43 = vunpack.i.h.bf16 %v3074_v53  ;;  %v3075_v45 = vunpack.i.l.bf16 %v3074_v53 }
 0x125   : > { %v729_v61 = vsel %vm333_vm0, %v555_v52, %v3076_v43  ;;  %v728_v62 = vsel %vm333_vm0, %v553_v32, %v3075_v45  ;;  %v703_v4 = vsel %vm333_vm0, %v3755_v58, %v3081_v36  ;;  %v702_v63 = vsel %vm333_vm0, %v3723_v38, %v3080_v41 }
 0x126   : > { %v3089_v44 = vpop.permute.xlu1 %3088  ;;  %v3084_v46 = vpop.permute.xlu0 %3083 }
 0x127   : > { %v3091_v51 = vunpack.i.h.bf16 %v3089_v44  ;;  %v3090_v20 = vunpack.i.l.bf16 %v3089_v44  ;;  %v3086_v37 = vunpack.i.h.bf16 %v3084_v46  ;;  %v3085_v0 = vunpack.i.l.bf16 %v3084_v46 }
 0x128   : > { %v559_v44 = vsel %vm550_vm8, %v556_v55, %v558_v9 }
 0x129   : > { %v737_v15 = vsel %vm710_vm9, %v729_v61, %v3086_v37  ;;  %v736_v17 = vsel %vm710_vm9, %v728_v62, %v3085_v0  ;;  %v712_v1 = vsel %vm710_vm9, %v703_v4, %v3091_v51  ;;  %v711_v18 = vsel %vm710_vm9, %v702_v63, %v3090_v20 }
 0x12a   : > { %v3099_v57 = vpop.permute.xlu1 %3098  ;;  %v3094_v60 = vpop.permute.xlu0 %3093  ;;  %v560_v37 = vrot.slane %v3817_v5, 4 }
 0x12b   : > { %v3101_v11 = vunpack.i.h.bf16 %v3099_v57  ;;  %v3100_v12 = vunpack.i.l.bf16 %v3099_v57  ;;  %v3096_v13 = vunpack.i.h.bf16 %v3094_v60  ;;  %v3095_v14 = vunpack.i.l.bf16 %v3094_v60 }
 0x12d   : > { %v745_v50 = vsel %vm719_vm10, %v737_v15, %v3096_v13  ;;  %v744_v19 = vsel %vm719_vm10, %v736_v17, %v3095_v14  ;;  %v721_v58 = vsel %vm719_vm10, %v712_v1, %v3101_v11  ;;  %v720_v38 = vsel %vm719_vm10, %v711_v18, %v3100_v12 }
 0x12e   : > { %v3109_v3 = vpop.permute.xlu1 %3108  ;;  %v3104_v49 = vpop.permute.xlu0 %3103  ;;  %963 = vmatprep.mubr.f32.mxu0 %v745_v50  ;;  %1068 = vmatprep.mubr.f32.mxu1 %v744_v19  ;;  %v562_v14 = vrot.slane %v3825_v16, 4 }
 0x12f   : > { %v3106_v26 = vunpack.i.h.bf16 %v3104_v49  ;;  %v3105_v23 = vunpack.i.l.bf16 %v3104_v49  ;;  %964 = vmatmul.mubr.f32.vlgmr.msra.gmra.mrb[0].mxu0 %v721_v58  ;;  %1069 = vmatmul.mubr.f32.vlgmr.msra.gmra.mrb[0].mxu1 %v720_v38  ;;  %v3111_v27 = vunpack.i.h.bf16 %v3109_v3  ;;  %v3110_v7 = vunpack.i.l.bf16 %v3109_v3 }
 0x130   : > { %1073 = vmatprep.mubr.f32.mxu1 %v745_v50  ;;  %2899 = vmatpush3.bf16.msra.mxu0 %v2896_v31 }
 0x131   : > { %v730_v28 = vsel %vm333_vm0, %v557_v25, %v3105_v23  ;;  %v704_v6 = vsel %vm333_vm0, %v3757_v59, %v3106_v26  ;;  %2901 = vmatprep.subr.bf16.mxu0 %v2900_v56  ;;  %v4099_v25 = vrot.slane %v3849_v39, 4 }
 0x132   : > { %v3119_v34 = vpop.permute.xlu1 %3118  ;;  %v3114_v30 = vpop.permute.xlu0 %3113  ;;  %v738_v41 = vsel %vm710_vm9, %v730_v28, %v3110_v7  ;;  %v713_v31 = vsel %vm710_vm9, %v704_v6, %v3111_v27 }
 0x133   : > { %v3116_v54 = vunpack.i.h.bf16 %v3114_v30  ;;  %v3115_v53 = vunpack.i.l.bf16 %v3114_v30  ;;  %1074 = vmatmul.mubr.f32.gmra.mrb[2].mxu1 %v721_v58  ;;  %v3121_v8 = vunpack.i.h.bf16 %v3119_v34  ;;  %v3120_v36 = vunpack.i.l.bf16 %v3119_v34 }
 0x134   : > { %2903 = vmatpush3.bf16.msra.mxu0 %v2900_v56 }
 0x135   : > { %v746_v35 = vsel %vm719_vm10, %v738_v41, %v3115_v53  ;;  %v722_v59 = vsel %vm719_vm10, %v713_v31, %v3116_v54  ;;  %2905 = vmatprep.subr.bf16.mxu0 %v2904_v29  ;;  %v731_v51 = vsel %vm333_vm0, %v559_v44, %v3120_v36  ;;  %v705_v20 = vsel %vm333_vm0, %v3777_v24, %v3121_v8 }
 0x136   : > { %v3129_v43 = vpop.permute.xlu1 %3128  ;;  %v3124_v45 = vpop.permute.xlu0 %3123  ;;  %968 = vmatprep.mubr.f32.mxu0 %v746_v35  ;;  %1078 = vmatprep.mubr.f32.mxu1 %v746_v35  ;;  %v561_v24 = vsel %vm550_vm8, %v558_v9, %v560_v37 }
 0x137   : > { %v3131_v46 = vunpack.i.h.bf16 %v3129_v43  ;;  %v3130_v47 = vunpack.i.l.bf16 %v3129_v43  ;;  %v3126_v48 = vunpack.i.h.bf16 %v3124_v45  ;;  %v3125_v2 = vunpack.i.l.bf16 %v3124_v45  ;;  %969 = vmatmul.mubr.f32.gmra.mrb[2].mxu0 %v722_v59  ;;  %1079 = vmatmul.mubr.f32.gmra.mrb[4].mxu1 %v722_v59 }
 0x138   : > { %2907 = vmatpush3.bf16.msra.mxu0 %v2904_v29  ;;  %v818_v43 = vrot.slane %v3894_v10, 4 }
 0x139   : > { %v739_v0 = vsel %vm710_vm9, %v731_v51, %v3125_v2  ;;  %v714_v52 = vsel %vm710_vm9, %v705_v20, %v3126_v48 }
 0x13a   : > { %v3139_v32 = vpop.permute.xlu1 %3138  ;;  %v3134_v55 = vpop.permute.xlu0 %3133  ;;  %v747_v56 = vsel %vm719_vm10, %v739_v0, %v3130_v47  ;;  %v723_v57 = vsel %vm719_vm10, %v714_v52, %v3131_v46 }
 0x13b   : > { %v3136_v60 = vunpack.i.h.bf16 %v3134_v55  ;;  %v3135_v61 = vunpack.i.l.bf16 %v3134_v55  ;;  %973 = vmatprep.mubr.f32.mxu0 %v747_v56  ;;  %1083 = vmatprep.mubr.f32.mxu1 %v747_v56  ;;  %v3141_v62 = vunpack.i.h.bf16 %v3139_v32  ;;  %v3140_v4 = vunpack.i.l.bf16 %v3139_v32 }
 0x13c   : > { %974 = vmatmul.mubr.f32.gmra.mrb[4].mxu0 %v723_v57  ;;  %1084 = vmatmul.mubr.f32.gmra.mrb[6].mxu1 %v723_v57 }
 0x13d   : > { %v732_v63 = vsel %vm333_vm0, %v561_v24, %v3135_v61  ;;  %v706_v11 = vsel %vm333_vm0, %v3795_v42, %v3136_v60  ;;  %v563_v42 = vsel %vm550_vm8, %v560_v37, %v562_v14 }
 0x13e   : > { %v3149_v12 = vpop.permute.xlu1 %3148  ;;  %v3144_v13 = vpop.permute.xlu0 %3143  ;;  %v740_v50 = vsel %vm710_vm9, %v732_v63, %v3140_v4  ;;  %v715_v19 = vsel %vm710_vm9, %v706_v11, %v3141_v62 }
 0x13f   : > { %v3146_v15 = vunpack.i.h.bf16 %v3144_v13  ;;  %v3145_v17 = vunpack.i.l.bf16 %v3144_v13  ;;  %v3151_v1 = vunpack.i.h.bf16 %v3149_v12  ;;  %v3150_v18 = vunpack.i.l.bf16 %v3149_v12 }
 0x140   : > { %v820_v12 = vrot.slane %v3922_v33, 4  ;;  %v566_v13 = vrot.slane %v3931_v40, 4 }
 0x141   : > { %v748_v58 = vsel %vm719_vm10, %v740_v50, %v3145_v17  ;;  %v724_v38 = vsel %vm719_vm10, %v715_v19, %v3146_v15  ;;  %v733_v27 = vsel %vm333_vm0, %v563_v42, %v3150_v18  ;;  %v707_v7 = vsel %vm333_vm0, %v3817_v5, %v3151_v1 }
 0x142   : > { %v3159_v3 = vpop.permute.xlu1 %3158  ;;  %v3154_v49 = vpop.permute.xlu0 %3153  ;;  %978 = vmatprep.mubr.f32.mxu0 %v748_v58  ;;  %1088 = vmatprep.mubr.f32.mxu1 %v748_v58  ;;  %v565_v5 = vsel %vm550_vm8, %v562_v14, %v4099_v25  ;;  %v567_v42 = vsel %vm550_vm8, %v4099_v25, %v566_v13 }
 0x143   : > { %v3161_v21 = vunpack.i.h.bf16 %v3159_v3  ;;  %v3160_v22 = vunpack.i.l.bf16 %v3159_v3  ;;  %v3156_v26 = vunpack.i.h.bf16 %v3154_v49  ;;  %v3155_v23 = vunpack.i.l.bf16 %v3154_v49  ;;  %979 = vmatmul.mubr.f32.gmra.mrb[6].mxu0 %v724_v38  ;;  %1089 = vmatmul.mubr.f32.gmra.mrb[8].mxu1 %v724_v38 }
 0x144   : > { %v821_v49 = vsel %vm550_vm8, %v818_v43, %v820_v12 }
 0x145   : > { %v741_v28 = vsel %vm710_vm9, %v733_v27, %v3155_v23  ;;  %v716_v6 = vsel %vm710_vm9, %v707_v7, %v3156_v26 }
 0x146   : > { %v3169_v29 = vpop.permute.xlu1 %3168  ;;  %v3164_v34 = vpop.permute.xlu0 %3163  ;;  %v749_v30 = vsel %vm719_vm10, %v741_v28, %v3160_v22  ;;  %v725_v9 = vsel %vm719_vm10, %v716_v6, %v3161_v21 }
 0x147   : > { %v3166_v54 = vunpack.i.h.bf16 %v3164_v34  ;;  %v3165_v53 = vunpack.i.l.bf16 %v3164_v34  ;;  %983 = vmatprep.mubr.f32.mxu0 %v749_v30  ;;  %1093 = vmatprep.mubr.f32.mxu1 %v749_v30  ;;  %v3171_v8 = vunpack.i.h.bf16 %v3169_v29  ;;  %v3170_v36 = vunpack.i.l.bf16 %v3169_v29 }
 0x148   : > { %984 = vmatmul.mubr.f32.gmra.mrb[8].mxu0 %v725_v9  ;;  %1094 = vmatmul.mubr.f32.gmra.mrb[10].mxu1 %v725_v9 }
 0x149   : > { %v734_v41 = vsel %vm333_vm0, %v565_v5, %v3165_v53  ;;  %v708_v31 = vsel %vm333_vm0, %v3825_v16, %v3166_v54  ;;  %v819_v16 = vsel %vm550_vm8, %v4099_v25, %v818_v43  ;;  %v1265_v53 = vld [vmem:[%s4950_s5 + $0x30] sm:$0xff]  ;;  %v1267_v5 = vld [vmem:[%s4950_s5 + $0x40] sm:$0xff] }
 0x14a   : > { %v3179_v35 = vpop.permute.xlu1 %3178  ;;  %v3174_v59 = vpop.permute.xlu0 %3173  ;;  %v742_v48 = vsel %vm710_vm9, %v734_v41, %v3170_v36  ;;  %v717_v2 = vsel %vm710_vm9, %v708_v31, %v3171_v8  ;;  %v1266_v8 = vld [vmem:[%s4950_s5 + $0x38] sm:$0xff]  ;;  %v1268_v41 = vld [vmem:[%s4950_s5 + $0x48] sm:$0xff]  ;;  %v1269_v31 = vld [vmem:[%s4950_s5 + $0x50] sm:$0xff] }
 0x14b   : > { %v3176_v45 = vunpack.i.h.bf16 %v3174_v59  ;;  %v3175_v44 = vunpack.i.l.bf16 %v3174_v59  ;;  %v3181_v46 = vunpack.i.h.bf16 %v3179_v35  ;;  %v3180_v47 = vunpack.i.l.bf16 %v3179_v35  ;;  %v1270_v59 = vld [vmem:[%s4950_s5 + $0x58] sm:$0xff] }
 0x14c   : > { %v2908_v36 = vpack.c.bf16 %v1266_v8, %v1265_v53  ;;  %v2912_v35 = vpack.c.bf16 %v1268_v41, %v1267_v5  ;;  %v2916_v43 = vpack.c.bf16 %v1270_v59, %v1269_v31 }
 0x14d   : > { %v750_v51 = vsel %vm719_vm10, %v742_v48, %v3175_v44  ;;  %v726_v20 = vsel %vm719_vm10, %v717_v2, %v3176_v45  ;;  %v860_v57 = vsel %vm333_vm0, %v819_v16, %v3180_v47  ;;  %v854_v60 = vsel %vm333_vm0, %v3849_v39, %v3181_v46  ;;  %v1271_v45 = vld [vmem:[%s4950_s5 + $0x60] sm:$0xff]  ;;  %v1272_v44 = vld [vmem:[%s4950_s5 + $0x68] sm:$0xff]  ;;  %v1273_v47 = vld [vmem:[%s4950_s5 + $0x70] sm:$0xff] }
 0x14e   : > { %v3189_v37 = vpop.permute.xlu1 %3188  ;;  %v3184_v0 = vpop.permute.xlu0 %3183  ;;  %988 = vmatprep.mubr.f32.mxu0 %v750_v51  ;;  %1098 = vmatprep.mubr.f32.mxu1 %v750_v51  ;;  %v2920_v46 = vpack.c.bf16 %v1272_v44, %v1271_v45  ;;  %v1274_v48 = vld [vmem:[%s4950_s5 + $0x78] sm:$0xff] }
 0x14f   : > { %v3191_v52 = vunpack.i.h.bf16 %v3189_v37  ;;  %v3190_v32 = vunpack.i.l.bf16 %v3189_v37  ;;  %v3186_v55 = vunpack.i.h.bf16 %v3184_v0  ;;  %v3185_v56 = vunpack.i.l.bf16 %v3184_v0  ;;  %989 = vmatmul.mubr.f32.gmra.mrb[10].mxu0 %v726_v20  ;;  %1099 = vmatmul.mubr.f32.gmra.mrb[12].mxu1 %v726_v20  ;;  %v4176_v0 = vld [vmem:[%s4948_s3] ss:$0 sm:$0xff] }
 0x150   : > { %2909 = vmatprep.subr.bf16.mxu0 %v2908_v36  ;;  %v2924_v2 = vpack.c.bf16 %v1274_v48, %v1273_v47 }
 0x151   : > { %v862_v61 = vsel %vm710_vm9, %v860_v57, %v3185_v56  ;;  %v856_v62 = vsel %vm710_vm9, %v854_v60, %v3186_v55  ;;  %2911 = vmatpush3.bf16.msra.mxu0 %v2908_v36 }
 0x152   : > { %v3199_v4 = vpop.permute.xlu1 %3198  ;;  %v3194_v24 = vpop.permute.xlu0 %3193  ;;  %v864_v63 = vsel %vm719_vm10, %v862_v61, %v3190_v32  ;;  %v858_v11 = vsel %vm719_vm10, %v856_v62, %v3191_v52  ;;  %2913 = vmatprep.subr.bf16.mxu0 %v2912_v35  ;;  %v4182_v61 = vld [vmem:[%s4949_s4] ss:$0 sm:$0xff] }
 0x153   : > { %993 = vmatprep.mubr.f32.mxu0 %v864_v63  ;;  %v3201_v14 = vunpack.i.h.bf16 %v3199_v4  ;;  %v3200_v15 = vunpack.i.l.bf16 %v3199_v4  ;;  %v3196_v17 = vunpack.i.h.bf16 %v3194_v24  ;;  %v3195_v1 = vunpack.i.l.bf16 %v3194_v24 }
 0x154   : > { %994 = vmatmul.mubr.f32.gmra.mrb[12].mxu0 %v858_v11 }
 0x155   : > { %v861_v33 = vsel %vm333_vm0, %v821_v49, %v3196_v17  ;;  %v735_v40 = vsel %vm333_vm0, %v567_v42, %v3195_v1  ;;  %v855_v26 = vsel %vm333_vm0, %v3894_v10, %v3201_v14  ;;  %v709_v23 = vsel %vm333_vm0, %v3849_v39, %v3200_v15  ;;  %2915 = vmatpush3.bf16.msra.mxu0 %v2912_v35 }
 0x156   : > { %v3209_v18 = vpop.permute.xlu1 %3208  ;;  %v3204_v50 = vpop.permute.xlu0 %3203  ;;  %2917 = vmatprep.subr.bf16.mxu0 %v2916_v43 }
 0x157   : > { %v3211_v19 = vunpack.i.h.bf16 %v3209_v18  ;;  %v3210_v58 = vunpack.i.l.bf16 %v3209_v18  ;;  %v3206_v38 = vunpack.i.h.bf16 %v3204_v50  ;;  %v3205_v3 = vunpack.i.l.bf16 %v3204_v50 }
 0x159   : > { %v863_v29 = vsel %vm710_vm9, %v861_v33, %v3206_v38  ;;  %v743_v25 = vsel %vm710_vm9, %v735_v40, %v3205_v3  ;;  %v857_v34 = vsel %vm710_vm9, %v855_v26, %v3211_v19  ;;  %v718_v30 = vsel %vm710_vm9, %v709_v23, %v3210_v58  ;;  %2919 = vmatpush3.bf16.msra.mxu0 %v2916_v43 }
 0x15a   : > { %v3219_v21 = vpop.permute.xlu1 %3218  ;;  %v3214_v22 = vpop.permute.xlu0 %3213  ;;  %2921 = vmatprep.subr.bf16.mxu0 %v2920_v46 }
 0x15b   : > { %v3221_v27 = vunpack.i.h.bf16 %v3219_v21  ;;  %v3220_v7 = vunpack.i.l.bf16 %v3219_v21  ;;  %v3216_v28 = vunpack.i.h.bf16 %v3214_v22  ;;  %v3215_v6 = vunpack.i.l.bf16 %v3214_v22 }
 0x15d   : > { %v865_v9 = vsel %vm719_vm10, %v863_v29, %v3216_v28  ;;  %v751_v54 = vsel %vm719_vm10, %v743_v25, %v3215_v6  ;;  %v859_v10 = vsel %vm719_vm10, %v857_v34, %v3221_v27  ;;  %v727_v39 = vsel %vm719_vm10, %v718_v30, %v3220_v7  ;;  %2923 = vmatpush3.bf16.msra.mxu0 %v2920_v46 }
 0x15e   : > { %998 = vmatprep.mubr.f32.mxu0 %v865_v9  ;;  %1103 = vmatprep.mubr.f32.mxu1 %v751_v54 }
 0x15f   : > { %999 = vmatmul.mubr.f32.gmra.mrb[14].mxu0 %v859_v10  ;;  %1104 = vmatmul.mubr.f32.gmra.mrb[14].mxu1 %v727_v39 }
 0x160   : > { %2925 = vmatprep.subr.bf16.mxu0 %v2924_v2 }
 0x161   : > { %2927 = vmatpush3.bf16.msra.mxu0 %v2924_v2 }
 0x16b   : > { %v1177_v51 = vpop.permute.xlu0 %1176  ;;  %v1182_v63 = vpop.permute.xlu1 %1181 }
 0x16c   : > { %v1220_v56 = vmul.f32 %v4176_v0, %v1177_v51  ;;  %v1221_v50 = vmul.f32 %v4176_v0, %v1182_v63 }
 0x16f   : > { %v1187_v19 = vpop.permute.xlu0 %1186  ;;  %v1192_v6 = vpop.permute.xlu1 %1191 }
 0x170   : > { %v1222_v23 = vmul.f32 %v4176_v0, %v1187_v19  ;;  %v1223_v45 = vmul.f32 %v4176_v0, %v1192_v6 }
 0x173   : > { %v1197_v44 = vpop.permute.xlu0 %1196 }
 0x202   : > { %v2504_v20 = vpop.f32.mrb[0].mxu0  ;;  %v2560_v37 = vpop.f32.mrb[0].mxu1 }
 0x203   : > { %v2505_v16 = vpop.f32.mrb[1].mxu0  ;;  %v2561_v52 = vpop.f32.mrb[1].mxu1 }
 0x204   : > { %v2506_v32 = vadd.f32 %v2505_v16, %v2504_v20  ;;  %v2562_v55 = vadd.f32 %v2561_v52, %v2560_v37 }
 0x206   : > { %v1071_v57 = vadd.f32 %v2562_v55, %v2506_v32  ;;  %v2563_v60 = vpop.f32.mrb[2].mxu1 }
 0x207   : > { %v2564_v62 = vpop.f32.mrb[3].mxu1 }
 0x208   : > { %v1228_v4 = vadd.f32 %v1220_v56, %v1071_v57  ;;  %v2565_v24 = vadd.f32 %v2564_v62, %v2563_v60 }
 0x20a   : > { %v1243_v11 = vadd.f32 %v4182_v61, %v1228_v4  ;;  %v2507_v12 = vpop.f32.mrb[2].mxu0  ;;  %v2566_v13 = vpop.f32.mrb[4].mxu1  ;;  %v1224_v4 = vmul.f32 %v4176_v0, %v1197_v44 }
 0x20b   : > { %v2508_v14 = vpop.f32.mrb[3].mxu0  ;;  %v2567_v15 = vpop.f32.mrb[5].mxu1 }
 0x20c   : > { %v1251_v17 = vmax.f32 %v1243_v11, 0.0  ;;  %v2509_v1 = vadd.f32 %v2508_v14, %v2507_v12  ;;  %v2568_v18 = vadd.f32 %v2567_v15, %v2566_v13  ;;  %v1202_v11 = vpop.permute.xlu1 %1201 }
 0x20e   : > { %v1076_v58 = vadd.f32 %v2565_v24, %v2509_v1  ;;  %2776 = vmatprep.mubr.f32.mxu0 %v1251_v17  ;;  %v2090_v22 = vrot.slane %v1251_v17, 7  ;;  %v2114_v9 = vrot.slane %v1251_v17, 1 }
 0x20f   : > { %v2510_v38 = vpop.f32.mrb[4].mxu0  ;;  %v2569_v3 = vpop.f32.mrb[6].mxu1 }
 0x210   : > { %v1229_v49 = vadd.f32 %v1221_v50, %v1076_v58  ;;  %v2511_v42 = vpop.f32.mrb[5].mxu0  ;;  %v2570_v21 = vpop.f32.mrb[7].mxu1  ;;  %v2113_v28 = vsel %vm660_vm6, %v1251_v17, %v2090_v22 }
 0x211   : > { %v2512_v33 = vadd.f32 %v2511_v42, %v2510_v38  ;;  %v2571_v40 = vadd.f32 %v2570_v21, %v2569_v3  ;;  %v2138_v8 = vmax.f32 %v2113_v28, %v1251_v17 }
 0x212   : > { %v1244_v26 = vadd.f32 %v4182_v61, %v1229_v49 }
 0x213   : > { %v1081_v27 = vadd.f32 %v2568_v18, %v2512_v33 }
 0x214   : > { %v1252_v7 = vmax.f32 %v1244_v26, 0.0 }
 0x215   : > { %v1230_v29 = vadd.f32 %v1222_v23, %v1081_v27  ;;  %v1207_v27 = vpop.permute.xlu0 %1206 }
 0x216   : > { %v2091_v25 = vrot.slane %v1252_v7, 7  ;;  %v2513_v34 = vpop.f32.mrb[6].mxu0  ;;  %v2572_v30 = vpop.f32.mrb[8].mxu1  ;;  %2777 = vmatmul.mubr.f32.vlgmr.msra.gmra.mrb[16].mxu0 %v1252_v7  ;;  %v2115_v54 = vrot.slane %v1252_v7, 1 }
 0x217   : > { %v1245_v10 = vadd.f32 %v4182_v61, %v1230_v29  ;;  %v2514_v39 = vpop.f32.mrb[7].mxu0  ;;  %v2573_v53 = vpop.f32.mrb[9].mxu1 }
 0x218   : > { %v2515_v36 = vadd.f32 %v2514_v39, %v2513_v34  ;;  %v2574_v5 = vadd.f32 %v2573_v53, %v2572_v30  ;;  %v2116_v41 = vsel %vm424_vm3, %v2114_v9, %v2115_v54  ;;  %v2092_v31 = vsel %vm660_vm6, %v2090_v22, %v2091_v25 }
 0x219   : > { %v1253_v35 = vmax.f32 %v1245_v10, 0.0  ;;  %v4192_v59 = vmax.f32 %v2138_v8, %v2116_v41  ;;  %v2139_v43 = vmax.f32 %v2092_v31, %v1252_v7  ;;  %v1225_v22 = vmul.f32 %v4176_v0, %v1202_v11 }
 0x21a   : > { %v1086_v46 = vadd.f32 %v2571_v40, %v2515_v36 }
 0x21b   : > { %v2117_v47 = vrot.slane %v1253_v35, 1  ;;  %v2516_v48 = vpop.f32.mrb[8].mxu0  ;;  %v2575_v2 = vpop.f32.mrb[10].mxu1  ;;  %2779 = vmatprep.mubr.f32.mxu0 %v1253_v35  ;;  %v2093_v51 = vrot.slane %v1253_v35, 7 }
 0x21c   : > { %v1231_v20 = vadd.f32 %v1223_v45, %v1086_v46  ;;  %v2517_v37 = vpop.f32.mrb[9].mxu0  ;;  %v2576_v16 = vpop.f32.mrb[11].mxu1 }
 0x21d   : > { %v2518_v52 = vadd.f32 %v2517_v37, %v2516_v48  ;;  %v2577_v32 = vadd.f32 %v2576_v16, %v2575_v2  ;;  %v2118_v55 = vsel %vm424_vm3, %v2115_v54, %v2117_v47  ;;  %v2094_v56 = vsel %vm660_vm6, %v2091_v25, %v2093_v51 }
 0x21e   : > { %v1246_v57 = vadd.f32 %v4182_v61, %v1231_v20  ;;  %v4198_v60 = vmax.f32 %v2139_v43, %v2118_v55  ;;  %v2140_v62 = vmax.f32 %v2094_v56, %v1253_v35  ;;  %v1226_v54 = vmul.f32 %v4176_v0, %v1207_v27  ;;  %v1212_v35 = vpop.permute.xlu1 %1211 }
 0x21f   : > { %v1091_v24 = vadd.f32 %v2574_v5, %v2518_v52  ;;  %v1227_v55 = vmul.f32 %v4176_v0, %v1212_v35  ;;  %v2441_v35 = vld [vmem:[%s4951_s6 + $0x148] sm:$0xff] }
 0x220   : > { %v1254_v63 = vmax.f32 %v1246_v57, 0.0 }
 0x221   : > { %v1232_v12 = vadd.f32 %v1224_v4, %v1091_v24 }
 0x222   : > { %v2519_v13 = vpop.f32.mrb[10].mxu0  ;;  %v2578_v14 = vpop.f32.mrb[12].mxu1  ;;  %2780 = vmatmul.mubr.f32.gmra.mrb[18].mxu0 %v1254_v63  ;;  %v2119_v15 = vrot.slane %v1254_v63, 1  ;;  %v2095_v17 = vrot.slane %v1254_v63, 7 }
 0x223   : > { %v1247_v1 = vadd.f32 %v4182_v61, %v1232_v12  ;;  %v2520_v18 = vpop.f32.mrb[11].mxu0  ;;  %v2579_v50 = vpop.f32.mrb[13].mxu1 }
 0x224   : > { %v2521_v19 = vadd.f32 %v2520_v18, %v2519_v13  ;;  %v2580_v58 = vadd.f32 %v2579_v50, %v2578_v14  ;;  %v2120_v38 = vsel %vm424_vm3, %v2117_v47, %v2119_v15  ;;  %v2096_v3 = vsel %vm660_vm6, %v2093_v51, %v2095_v17  ;;  %v2448_v18 = vld [vmem:[%s4951_s6 + $0x180] sm:$0xff] }
 0x225   : > { %v1255_v49 = vmax.f32 %v1247_v1, 0.0  ;;  %v4204_v42 = vmax.f32 %v2140_v62, %v2120_v38  ;;  %v2141_v21 = vmax.f32 %v2096_v3, %v1254_v63  ;;  %v2432_v50 = vld [vmem:[%s4951_s6 + $0x100] sm:$0xff]  ;;  %v2450_v38 = vld [vmem:[%s4951_s6 + $0x190] sm:$0xff]  ;;  %v2451_v3 = vld [vmem:[%s4951_s6 + $0x198] sm:$0xff] }
 0x226   : > { %v1096_v33 = vadd.f32 %v2577_v32, %v2521_v19 }
 0x227   : > { %v2522_v40 = vpop.f32.mrb[12].mxu0  ;;  %2782 = vmatprep.mubr.f32.mxu0 %v1255_v49  ;;  %v2121_v26 = vrot.slane %v1255_v49, 1  ;;  %v2097_v23 = vrot.slane %v1255_v49, 7 }
 0x228   : > { %v1233_v7 = vadd.f32 %v1225_v22, %v1096_v33  ;;  %v2523_v28 = vpop.f32.mrb[13].mxu0  ;;  %v2434_v22 = vld [vmem:[%s4951_s6 + $0x110] sm:$0xff]  ;;  %v2435_v33 = vld [vmem:[%s4951_s6 + $0x118] sm:$0xff] }
 0x229   : > { %v2524_v6 = vadd.f32 %v2523_v28, %v2522_v40  ;;  %v2122_v29 = vsel %vm424_vm3, %v2119_v15, %v2121_v26  ;;  %v2098_v25 = vsel %vm660_vm6, %v2095_v17, %v2097_v23  ;;  %v2452_v40 = vld [vmem:[%s4951_s6 + $0x1a0] sm:$0xff]  ;;  %v2437_v28 = vld [vmem:[%s4951_s6 + $0x128] sm:$0xff] }
 0x22a   : > { %v1248_v34 = vadd.f32 %v4182_v61, %v1233_v7  ;;  %v4210_v30 = vmax.f32 %v2141_v21, %v2122_v29  ;;  %v2142_v9 = vmax.f32 %v2098_v25, %v1255_v49  ;;  %v2932_v21 = vpack.c.bf16 %v2451_v3, %v2450_v38  ;;  %v2436_v7 = vld [vmem:[%s4951_s6 + $0x120] sm:$0xff]  ;;  %v2455_v29 = vld [vmem:[%s4951_s6 + $0x1b8] sm:$0xff]  ;;  %v1727_v3 = vld [vmem:[%s4951_s6 + $0x10] sm:$0xff] }
 0x22b   : > { %v1101_v10 = vadd.f32 %v2580_v58, %v2524_v6  ;;  %v2433_v58 = vld [vmem:[%s4951_s6 + $0x108] sm:$0xff]  ;;  %v2454_v6 = vld [vmem:[%s4951_s6 + $0x1b0] sm:$0xff]  ;;  %v2938_v25 = vpack.c.bf16 %v2437_v28, %v2436_v7  ;;  %v2463_v38 = vld [vmem:[%s4951_s6 + $0x1f8] sm:$0xff] }
 0x22c   : > { %v1256_v39 = vmax.f32 %v1248_v34, 0.0  ;;  %v2930_v49 = vpack.c.bf16 %v2433_v58, %v2432_v50  ;;  %v1741_v34 = vld [vmem:[%s4951_s6 + $0x80] sm:$0xff] }
 0x22d   : > { %v1234_v53 = vadd.f32 %v1226_v54, %v1101_v10  ;;  %v2940_v54 = vpack.c.bf16 %v2455_v29, %v2454_v6  ;;  %v2438_v10 = vld [vmem:[%s4951_s6 + $0x130] sm:$0xff] }
 0x22e   : > { %2783 = vmatmul.mubr.f32.gmra.mrb[20].mxu0 %v1256_v39  ;;  %v2123_v8 = vrot.slane %v1256_v39, 1  ;;  %v2099_v36 = vrot.slane %v1256_v39, 7 }
 0x22f   : > { %v1249_v5 = vadd.f32 %v4182_v61, %v1234_v53 }
 0x230   : > { %v2124_v41 = vsel %vm424_vm3, %v2121_v26, %v2123_v8  ;;  %v2100_v31 = vsel %vm660_vm6, %v2097_v23, %v2099_v36  ;;  %v2453_v26 = vld [vmem:[%s4951_s6 + $0x1a8] sm:$0xff]  ;;  %v2934_v23 = vpack.c.bf16 %v2435_v33, %v2434_v22 }
 0x231   : > { %v1257_v43 = vmax.f32 %v1249_v5, 0.0  ;;  %v4216_v45 = vmax.f32 %v2142_v9, %v2124_v41  ;;  %v2143_v44 = vmax.f32 %v2100_v31, %v1256_v39  ;;  %v2936_v27 = vpack.c.bf16 %v2453_v26, %v2452_v40  ;;  %v1742_v9 = vld [vmem:[%s4951_s6 + $0x88] sm:$0xff]  ;;  %v2439_v39 = vld [vmem:[%s4951_s6 + $0x138] sm:$0xff]  ;;  %v2440_v31 = vld [vmem:[%s4951_s6 + $0x140] sm:$0xff] }
 0x232   : > { %v2525_v46 = vpop.f32.mrb[14].mxu0  ;;  %v2581_v47 = vpop.f32.mrb[14].mxu1  ;;  %v2960_v53 = vpack.c.bf16 %v1742_v9, %v1741_v34  ;;  %v2942_v5 = vpack.c.bf16 %v2439_v39, %v2438_v10 }
 0x233   : > { %v2526_v48 = vpop.f32.mrb[15].mxu0  ;;  %v2582_v2 = vpop.f32.mrb[15].mxu1  ;;  %2785 = vmatprep.mubr.f32.mxu0 %v1257_v43  ;;  %v2125_v51 = vrot.slane %v1257_v43, 1  ;;  %v2101_v20 = vrot.slane %v1257_v43, 7 }
 0x234   : > { %v2527_v37 = vadd.f32 %v2526_v48, %v2525_v46  ;;  %v2583_v16 = vadd.f32 %v2582_v2, %v2581_v47  ;;  %2961 = vmatprep.subr.bf16.mxu0 %v2960_v53  ;;  %v2946_v46 = vpack.c.bf16 %v2441_v35, %v2440_v31  ;;  %v2442_v48 = vld [vmem:[%s4951_s6 + $0x150] sm:$0xff]  ;;  %v2443_v2 = vld [vmem:[%s4951_s6 + $0x158] sm:$0xff] }
 0x235   : > { %v2126_v52 = vsel %vm424_vm3, %v2123_v8, %v2125_v51  ;;  %v2102_v32 = vsel %vm660_vm6, %v2099_v36, %v2101_v20  ;;  %v2456_v8 = vld [vmem:[%s4951_s6 + $0x1c0] sm:$0xff]  ;;  %v2457_v36 = vld [vmem:[%s4951_s6 + $0x1c8] sm:$0xff] }
 0x236   : > { %v1106_v56 = vadd.f32 %v2583_v16, %v2527_v37  ;;  %v4221_v57 = vmax.f32 %v2143_v44, %v2126_v52  ;;  %v2144_v62 = vmax.f32 %v2102_v32, %v1257_v43  ;;  %v2944_v41 = vpack.c.bf16 %v2457_v36, %v2456_v8  ;;  %v2458_v43 = vld [vmem:[%s4951_s6 + $0x1d0] sm:$0xff]  ;;  %v2459_v44 = vld [vmem:[%s4951_s6 + $0x1d8] sm:$0xff] }
 0x237   : > { %v2948_v47 = vpack.c.bf16 %v2459_v44, %v2458_v43  ;;  %v2446_v36 = vld [vmem:[%s4951_s6 + $0x170] sm:$0xff]  ;;  %v2447_v43 = vld [vmem:[%s4951_s6 + $0x178] sm:$0xff]  ;;  %v1745_v44 = vld [vmem:[%s4951_s6 + $0xa0] sm:$0xff] }
 0x238   : > { %v1235_v4 = vadd.f32 %v1227_v55, %v1106_v56  ;;  %v2460_v55 = vld [vmem:[%s4951_s6 + $0x1e0] sm:$0xff]  ;;  %v2461_v56 = vld [vmem:[%s4951_s6 + $0x1e8] sm:$0xff] }
 0x23a   : > { %v1250_v24 = vadd.f32 %v4182_v61, %v1235_v4  ;;  %v2449_v61 = vld [vmem:[%s4951_s6 + $0x188] sm:$0xff]  ;;  %v2952_v4 = vpack.c.bf16 %v2461_v56, %v2460_v55  ;;  %v2958_v56 = vpack.c.bf16 %v2447_v43, %v2446_v36 }
 0x23b   : > { %v2928_v19 = vpack.c.bf16 %v2449_v61, %v2448_v18  ;;  %v2462_v18 = vld [vmem:[%s4951_s6 + $0x1f0] sm:$0xff] }
 0x23c   : > { %v1258_v63 = vmax.f32 %v1250_v24, 0.0  ;;  %v1726_v24 = vld [vmem:[%s4951_s6 + $0x8] sm:$0xff]  ;;  %v2956_v26 = vpack.c.bf16 %v2463_v38, %v2462_v18 }
 0x23d   : > { %2929 = vmatprep.subr.bf16.mxu1 %v2928_v19 }
 0x23e   : > { %2786 = vmatmul.mubr.f32.gmra.mrb[22].mxu0 %v1258_v63  ;;  %v2127_v11 = vrot.slane %v1258_v63, 1  ;;  %v2103_v12 = vrot.slane %v1258_v63, 7  ;;  %2931 = vmatpush3.bf16.msra.mxu1 %v2930_v49  ;;  %v1728_v49 = vld [vmem:[%s4951_s6 + $0x18] sm:$0xff] }
 0x23f   : > { %2933 = vmatprep.subr.bf16.mxu1 %v2932_v21 }
 0x240   : > { %v2128_v13 = vsel %vm424_vm3, %v2125_v51, %v2127_v11  ;;  %v2104_v14 = vsel %vm660_vm6, %v2101_v20, %v2103_v12  ;;  %v2137_v0 = vsel %vm424_vm3, %v2127_v11, %v1258_v63  ;;  %v2950_v51 = vpack.c.bf16 %v2443_v2, %v2442_v48  ;;  %v2445_v11 = vld [vmem:[%s4951_s6 + $0x168] sm:$0xff] }
 0x241   : > { %v4226_v15 = vmax.f32 %v2144_v62, %v2128_v13  ;;  %v2145_v17 = vmax.f32 %v2104_v14, %v1258_v63  ;;  %v1725_v62 = vld [vmem:[%s4951_s6] sm:$0xff] }
 0x242   : > { %2935 = vmatpush3.bf16.msra.mxu1 %v2934_v23  ;;  %v2444_v63 = vld [vmem:[%s4951_s6 + $0x160] sm:$0xff]  ;;  %v2962_v13 = vpack.c.bf16 %v1726_v24, %v1725_v62  ;;  %v2966_v23 = vpack.c.bf16 %v1728_v49, %v1727_v3  ;;  %v1748_v24 = vld [vmem:[%s4951_s6 + $0xb8] sm:$0xff] }
 0x243   : > { %v4229_v1 = vmax.f32 %v2145_v17, %v2137_v0  ;;  %2937 = vmatprep.subr.bf16.mxu1 %v2936_v27  ;;  %v2954_v14 = vpack.c.bf16 %v2445_v11, %v2444_v63  ;;  %v1743_v17 = vld [vmem:[%s4951_s6 + $0x90] sm:$0xff]  ;;  %v1744_v0 = vld [vmem:[%s4951_s6 + $0x98] sm:$0xff]  ;;  %v1749_v49 = vld [vmem:[%s4951_s6 + $0xc0] sm:$0xff] }
 0x244   : > { %v2964_v58 = vpack.c.bf16 %v1744_v0, %v1743_v17  ;;  %2963 = vmatpush3.bf16.msra.mxu0 %v2962_v13  ;;  %v1731_v17 = vld [vmem:[%s4951_s6 + $0x30] sm:$0xff]  ;;  %v1732_v0 = vld [vmem:[%s4951_s6 + $0x38] sm:$0xff] }
 0x246   : > { %2939 = vmatpush3.bf16.msra.mxu1 %v2938_v25  ;;  %2965 = vmatprep.subr.bf16.mxu0 %v2964_v58 }
 0x247   : > { %2941 = vmatprep.subr.bf16.mxu1 %v2940_v54 }
 0x248   : > { %2967 = vmatpush3.bf16.msra.mxu0 %v2966_v23 }
 0x24a   : > { %2943 = vmatpush3.bf16.msra.mxu1 %v2942_v5 }
 0x24b   : > { %2945 = vmatprep.subr.bf16.mxu1 %v2944_v41 }
 0x24e   : > { %2947 = vmatpush3.bf16.msra.mxu1 %v2946_v46  ;;  %v1746_v46 = vld [vmem:[%s4951_s6 + $0xa8] sm:$0xff] }
 0x24f   : > { %2949 = vmatprep.subr.bf16.mxu1 %v2948_v47  ;;  %v2968_v62 = vpack.c.bf16 %v1746_v46, %v1745_v44 }
 0x251   : > { %2969 = vmatprep.subr.bf16.mxu0 %v2968_v62 }
 0x252   : > { %2951 = vmatpush3.bf16.msra.mxu1 %v2950_v51 }
 0x253   : > { %2953 = vmatprep.subr.bf16.mxu1 %v2952_v4  ;;  %v1747_v4 = vld [vmem:[%s4951_s6 + $0xb0] sm:$0xff] }
 0x254   : > { %v2972_v23 = vpack.c.bf16 %v1748_v24, %v1747_v4 }
 0x256   : > { %2955 = vmatpush3.bf16.msra.mxu1 %v2954_v14 }
 0x257   : > { %2957 = vmatprep.subr.bf16.mxu1 %v2956_v26  ;;  %v1750_v26 = vld [vmem:[%s4951_s6 + $0xc8] sm:$0xff] }
 0x25a   : > { %2959 = vmatpush3.bf16.msra.mxu1 %v2958_v56 }
 0x2e9   : > { %v2778_v20 = vpop.f32.mrb[16].mxu0 }
 0x2ea   : > { %1381 = vst.msk [vmem:[#allocation2 + $0xf] sm:$0xff] %vm333_vm0, %v2778_v20  ;;  %v1341_v37 = vpop.f32.mrb[17].mxu0  ;;  %v1729_v20 = vld [vmem:[%s4951_s6 + $0x20] sm:$0xff] }
 0x2eb   : > { %1380 = vst.msk [vmem:[#allocation2 + $0x7] sm:$0xff] %vm333_vm0, %v1341_v37  ;;  %v1730_v37 = vld [vmem:[%s4951_s6 + $0x28] sm:$0xff] }
 0x2ec   : > { %v2970_v14 = vpack.c.bf16 %v1730_v37, %v1729_v20 }
 0x2ee   : > { %2971 = vmatpush3.bf16.msra.mxu0 %v2970_v14 }
 0x2ef   : > { %2973 = vmatprep.subr.bf16.mxu0 %v2972_v23  ;;  %v2154_v23 = vld [vmem:[%s4952_s7] sm:$0xff] }
 0x2f2   : > { %v4313_v32 = vld [vmem:[#allocation2 + $0x8] sm:$0xff]  ;;  %v4437_v3 = vld [vmem:[#allocation2] sm:$0xff] }
 0x2f3   : > { %v1448_v12 = vrot.slane %v4313_v32, 2  ;;  %v1596_v61 = vrot.slane %v4313_v32, 6  ;;  %v1407_v50 = vrot.slane %v4313_v32, 1  ;;  %v1555_v19 = vrot.slane %v4313_v32, 5 }
 0x2f4   : > { %v1489_v33 = vrot.slane %v4313_v32, 3  ;;  %v1637_v40 = vrot.slane %v4313_v32, 7 }
 0x2f5   : > { %v2781_v16 = vpop.f32.mrb[18].mxu0 }
 0x2f6   : > { %1383 = vst.msk [vmem:[#allocation2 + $0x1f] sm:$0xff] %vm333_vm0, %v2781_v16  ;;  %v1351_v52 = vpop.f32.mrb[19].mxu0 }
 0x2f7   : > { %1382 = vst.msk [vmem:[#allocation2 + $0x17] sm:$0xff] %vm333_vm0, %v1351_v52 }
 0x2fe   : > { %v4355_v21 = vld [vmem:[#allocation2 + $0x10] sm:$0xff]  ;;  %v4357_v22 = vld [vmem:[#allocation2 + $0x18] sm:$0xff] }
 0x2ff   : > { %v1450_v27 = vrot.slane %v4355_v21, 2  ;;  %v1598_v7 = vrot.slane %v4355_v21, 6  ;;  %v1409_v28 = vrot.slane %v4355_v21, 1  ;;  %v1557_v6 = vrot.slane %v4355_v21, 5 }
 0x300   : > { %v1411_v29 = vrot.slane %v4357_v22, 1  ;;  %v1559_v25 = vrot.slane %v4357_v22, 5  ;;  %v1491_v34 = vrot.slane %v4355_v21, 3  ;;  %v1639_v9 = vrot.slane %v4355_v21, 7 }
 0x301   : > { %v2784_v54 = vpop.f32.mrb[20].mxu0  ;;  %v1451_v10 = vsel %vm466_vm5, %v1448_v12, %v1450_v27  ;;  %v1599_v39 = vsel %vm618_vm4, %v1596_v61, %v1598_v7  ;;  %v1410_v53 = vsel %vm424_vm3, %v1407_v50, %v1409_v28  ;;  %v1558_v8 = vsel %vm576_vm2, %v1555_v19, %v1557_v6 }
 0x302   : > { %1385 = vst.msk [vmem:[#allocation2 + $0x2f] sm:$0xff] %vm333_vm0, %v2784_v54  ;;  %v1361_v5 = vpop.f32.mrb[21].mxu0  ;;  %v3227_v41 = vpack.i.bf16 %v1451_v10, %v1599_v39  ;;  %v3222_v31 = vpack.i.bf16 %v1410_v53, %v1558_v8  ;;  %v1412_v35 = vsel %vm424_vm3, %v1409_v28, %v1411_v29  ;;  %v1560_v47 = vsel %vm576_vm2, %v1557_v6, %v1559_v25  ;;  %v1734_v28 = vld [vmem:[%s4951_s6 + $0x48] sm:$0xff] }
 0x303   : > { %1384 = vst.msk [vmem:[#allocation2 + $0x27] sm:$0xff] %vm333_vm0, %v1361_v5  ;;  %v1492_v48 = vsel %vm508_vm7, %v1489_v33, %v1491_v34  ;;  %v1640_v2 = vsel %vm660_vm6, %v1637_v40, %v1639_v9  ;;  %v1493_v51 = vrot.slane %v4357_v22, 3  ;;  %v1641_v16 = vrot.slane %v4357_v22, 7 }
 0x304   : > { %3228 = vrot.lane.b32.xlu1 %v3227_v41, %s4969_s17  ;;  %3223 = vrot.lane.b32.xlu0 %v3222_v31, %s4968_s24  ;;  %v1452_v52 = vrot.slane %v4357_v22, 2  ;;  %v1600_v55 = vrot.slane %v4357_v22, 6  ;;  %v3237_v63 = vpack.i.bf16 %v1412_v35, %v1560_v47  ;;  %v3232_v11 = vpack.i.bf16 %v1492_v48, %v1640_v2  ;;  %v1751_v41 = vld [vmem:[%s4951_s6 + $0xd0] sm:$0xff]  ;;  %v1752_v31 = vld [vmem:[%s4951_s6 + $0xd8] sm:$0xff] }
 0x305   : > { %v1494_v13 = vsel %vm508_vm7, %v1491_v34, %v1493_v51  ;;  %v1642_v18 = vsel %vm660_vm6, %v1639_v9, %v1641_v16  ;;  %v1554_v10 = vrot.slane %v4437_v3, 5  ;;  %v2976_v39 = vpack.c.bf16 %v1750_v26, %v1749_v49 }
 0x306   : > { %v1453_v58 = vsel %vm466_vm5, %v1450_v27, %v1452_v52  ;;  %v1601_v38 = vsel %vm618_vm4, %v1598_v7, %v1600_v55  ;;  %v2974_v27 = vpack.c.bf16 %v1732_v0, %v1731_v17  ;;  %v1733_v7 = vld [vmem:[%s4951_s6 + $0x40] sm:$0xff]  ;;  %v3247_v6 = vpack.i.bf16 %v1494_v13, %v1642_v18  ;;  %v1754_v13 = vld [vmem:[%s4951_s6 + $0xe8] sm:$0xff] }
 0x307   : > { %v3242_v34 = vpack.i.bf16 %v1453_v58, %v1601_v38  ;;  %v2978_v46 = vpack.c.bf16 %v1734_v28, %v1733_v7  ;;  %v2980_v4 = vpack.c.bf16 %v1752_v31, %v1751_v41  ;;  %v1406_v17 = vrot.slane %v4437_v3, 1  ;;  %v1737_v18 = vld [vmem:[%s4951_s6 + $0x60] sm:$0xff] }
 0x308   : > { %3238 = vrot.lane.b32.xlu1 %v3237_v63, %s4968_s24  ;;  %3233 = vrot.lane.b32.xlu0 %v3232_v11, %s4967_s23  ;;  %v1753_v11 = vld [vmem:[%s4951_s6 + $0xe0] sm:$0xff] }
 0x309   : > { %2975 = vmatpush3.bf16.msra.mxu0 %v2974_v27  ;;  %v2984_v26 = vpack.c.bf16 %v1754_v13, %v1753_v11  ;;  %v2155_v27 = vld [vmem:[%s4952_s7 + $0x8] sm:$0xff]  ;;  %v1408_v41 = vsel %vm424_vm3, %v1406_v17, %v1407_v50 }
 0x30a   : > { %v4453_v9 = vld [vmem:[#allocation2 + $0x20] sm:$0xff]  ;;  %v4455_v54 = vld [vmem:[#allocation2 + $0x28] sm:$0xff]  ;;  %2977 = vmatprep.subr.bf16.mxu0 %v2976_v39  ;;  %v1756_v39 = vld [vmem:[%s4951_s6 + $0xf8] sm:$0xff] }
 0x30b   : > { %v1454_v53 = vrot.slane %v4453_v9, 2  ;;  %v1602_v8 = vrot.slane %v4453_v9, 6  ;;  %v1413_v36 = vrot.slane %v4453_v9, 1  ;;  %v1561_v5 = vrot.slane %v4453_v9, 5 }
 0x30c   : > { %3248 = vrot.lane.b32.xlu1 %v3247_v6, %s4967_s23  ;;  %3243 = vrot.lane.b32.xlu0 %v3242_v34, %s4969_s17  ;;  %v1563_v35 = vrot.slane %v4455_v54, 5  ;;  %v1495_v43 = vrot.slane %v4453_v9, 3  ;;  %v1643_v44 = vrot.slane %v4453_v9, 7  ;;  %v1604_v62 = vrot.slane %v4455_v54, 6 }
 0x30d   : > { %v1455_v47 = vsel %vm466_vm5, %v1452_v52, %v1454_v53  ;;  %v1603_v48 = vsel %vm618_vm4, %v1600_v55, %v1602_v8  ;;  %v1414_v2 = vsel %vm424_vm3, %v1411_v29, %v1413_v36  ;;  %v1562_v20 = vsel %vm576_vm2, %v1559_v25, %v1561_v5  ;;  %v1735_v52 = vld [vmem:[%s4951_s6 + $0x50] sm:$0xff]  ;;  %v1736_v55 = vld [vmem:[%s4951_s6 + $0x58] sm:$0xff]  ;;  %2979 = vmatpush3.bf16.msra.mxu0 %v2978_v46 }
 0x30e   : > { %v3257_v37 = vpack.i.bf16 %v1455_v47, %v1603_v48  ;;  %v3252_v56 = vpack.i.bf16 %v1414_v2, %v1562_v20  ;;  %v1564_v29 = vsel %vm576_vm2, %v1561_v5, %v1563_v35  ;;  %v1496_v25 = vsel %vm508_vm7, %v1493_v51, %v1495_v43  ;;  %2981 = vmatprep.subr.bf16.mxu0 %v2980_v4 }
 0x30f   : > { %v1644_v24 = vsel %vm660_vm6, %v1641_v16, %v1643_v44  ;;  %v1415_v63 = vrot.slane %v4455_v54, 1  ;;  %v1556_v51 = vsel %vm576_vm2, %v1554_v10, %v1555_v19  ;;  %v1595_v16 = vrot.slane %v4437_v3, 6  ;;  %v1738_v19 = vld [vmem:[%s4951_s6 + $0x68] sm:$0xff]  ;;  %v1755_v10 = vld [vmem:[%s4951_s6 + $0xf0] sm:$0xff] }
 0x310   : > { %3258 = vrot.lane.b32.xlu1 %v3257_v37, %s4969_s17  ;;  %3253 = vrot.lane.b32.xlu0 %v3252_v56, %s4968_s24  ;;  %v2982_v0 = vpack.c.bf16 %v1736_v55, %v1735_v52  ;;  %v3267_v38 = vpack.i.bf16 %v1564_v29, %v1556_v51  ;;  %v3262_v49 = vpack.i.bf16 %v1496_v25, %v1644_v24  ;;  %v1645_v6 = vrot.slane %v4455_v54, 7  ;;  %v1739_v37 = vld [vmem:[%s4951_s6 + $0x70] sm:$0xff] }
 0x311   : > { %v2787_v14 = vpop.f32.mrb[22].mxu0  ;;  %v1605_v7 = vsel %vm618_vm4, %v1602_v8, %v1604_v62  ;;  %v1416_v28 = vsel %vm424_vm3, %v1413_v36, %v1415_v63  ;;  %v1456_v34 = vrot.slane %v4455_v54, 2  ;;  %v1636_v8 = vrot.slane %v4437_v3, 7 }
 0x312   : > { %1387 = vst.msk [vmem:[#allocation2 + $0x3f] sm:$0xff] %vm333_vm0, %v2787_v14  ;;  %v1371_v58 = vpop.f32.mrb[23].mxu0  ;;  %v1447_v36 = vrot.slane %v4437_v3, 2  ;;  %v1597_v5 = vsel %vm618_vm4, %v1595_v16, %v1596_v61  ;;  %2983 = vmatpush3.bf16.msra.mxu0 %v2982_v0  ;;  %v2986_v31 = vpack.c.bf16 %v1738_v19, %v1737_v18  ;;  %v4551_v46 = vpack.c.bf16 %v2155_v27, %v2154_v23  ;;  %v1740_v61 = vld [vmem:[%s4951_s6 + $0x78] sm:$0xff] }
 0x313   : > { %1386 = vst.msk [vmem:[#allocation2 + $0x37] sm:$0xff] %vm333_vm0, %v1371_v58  ;;  %v3277_v47 = vpack.i.bf16 %v1605_v7, %v1597_v5  ;;  %v3272_v48 = vpack.i.bf16 %v1416_v28, %v1408_v41  ;;  %v1497_v2 = vrot.slane %v4455_v54, 3  ;;  %2985 = vmatprep.subr.bf16.mxu0 %v2984_v26  ;;  %v2988_v20 = vpack.c.bf16 %v1756_v39, %v1755_v10 }
 0x314   : > { %3268 = vrot.lane.b32.xlu1 %v3267_v38, %s4968_s24  ;;  %3263 = vrot.lane.b32.xlu0 %v3262_v49, %s4967_s23  ;;  %v1646_v50 = vsel %vm660_vm6, %v1643_v44, %v1645_v6  ;;  %v1457_v56 = vsel %vm466_vm5, %v1454_v53, %v1456_v34  ;;  %v1488_v4 = vrot.slane %v4437_v3, 3  ;;  %v1638_v52 = vsel %vm660_vm6, %v1636_v8, %v1637_v40 }
 0x315   : > { %2993 = vmatprep.subr.bf16.mxu1 %v4551_v46  ;;  %v1449_v44 = vsel %vm466_vm5, %v1447_v36, %v1448_v12  ;;  %v2990_v55 = vpack.c.bf16 %v1740_v61, %v1739_v37  ;;  %v3287_v29 = vpack.i.bf16 %v1646_v50, %v1638_v52  ;;  %v1498_v25 = vsel %vm508_vm7, %v1495_v43, %v1497_v2  ;;  %v4640_v37 = vld [vmem:[#allocation2 + $0x48] sm:$0x7f] }
 0x316   : > { %2987 = vmatpush3.bf16.msra.mxu0 %v2986_v31  ;;  %v3282_v53 = vpack.i.bf16 %v1457_v56, %v1449_v44  ;;  %v1490_v43 = vsel %vm508_vm7, %v1488_v4, %v1489_v33  ;;  %v1763_v52 = vrot.slane %v4640_v37, 1  ;;  %v1799_v44 = vrot.slane %v4640_v37, 5 }
 0x317   : > { %2989 = vmatprep.subr.bf16.mxu0 %v2988_v20  ;;  %v3292_v17 = vpack.i.bf16 %v1498_v25, %v1490_v43 }
 0x318   : > { %3278 = vrot.lane.b32.xlu1 %v3277_v47, %s4969_s17  ;;  %3273 = vrot.lane.b32.xlu0 %v3272_v48, %s4968_s24 }
 0x319   : > { %v4605_v26 = vld [vmem:[#allocation2 + $0x40] sm:$0xff] }
 0x31a   : > { %v4577_v24 = vld [vmem:[#allocation2 + $0x30] sm:$0xff]  ;;  %v4583_v12 = vld [vmem:[#allocation2 + $0x38] sm:$0xff]  ;;  %2991 = vmatpush3.bf16.msra.mxu0 %v2990_v55  ;;  %v1761_v7 = vrot.slane %v4605_v26, 1  ;;  %v1797_v28 = vrot.slane %v4605_v26, 5  ;;  %v1771_v41 = vrot.slane %v4605_v26, 2  ;;  %v1807_v31 = vrot.slane %v4605_v26, 6 }
 0x31b   : > { %v1417_v11 = vrot.slane %v4577_v24, 1  ;;  %v1565_v13 = vrot.slane %v4577_v24, 5  ;;  %v1458_v40 = vrot.slane %v4577_v24, 2  ;;  %v1606_v14 = vrot.slane %v4577_v24, 6  ;;  %v4660_v43 = vld [vmem:[#allocation2 + $0x40] sm:$0x7f] }
 0x31c   : > { %3288 = vrot.lane.b32.xlu1 %v3287_v29, %s4967_s23  ;;  %3283 = vrot.lane.b32.xlu0 %v3282_v53, %s4969_s17  ;;  %v1499_v51 = vrot.slane %v4577_v24, 3  ;;  %v1647_v16 = vrot.slane %v4577_v24, 7  ;;  %v4600_v49 = vrot.slane %v4583_v12, 1  ;;  %v4603_v33 = vrot.slane %v4583_v12, 5 }
 0x31d   : > { %v1418_v0 = vsel %vm424_vm3, %v1415_v63, %v1417_v11  ;;  %v1566_v18 = vsel %vm576_vm2, %v1563_v35, %v1565_v13  ;;  %v1459_v38 = vsel %vm466_vm5, %v1456_v34, %v1458_v40  ;;  %v1607_v63 = vsel %vm618_vm4, %v1604_v62, %v1606_v14 }
 0x31e   : > { %v3297_v58 = vpack.i.bf16 %v1418_v0, %v1566_v18  ;;  %v1500_v19 = vsel %vm508_vm7, %v1497_v2, %v1499_v51  ;;  %v1648_v35 = vsel %vm660_vm6, %v1645_v6, %v1647_v16  ;;  %v4613_v23 = vrot.slane %v4583_v12, 2 }
 0x31f   : > { %v4618_v27 = vrot.slane %v4583_v12, 6  ;;  %v3302_v34 = vpack.i.bf16 %v1459_v38, %v1607_v63  ;;  %v3307_v62 = vpack.i.bf16 %v1500_v19, %v1648_v35  ;;  %v1420_v10 = vsel %vm424_vm3, %v1417_v11, %v4600_v49 }
 0x320   : > { %3293 = vrot.lane.b32.xlu0 %v3292_v17, %s4967_s23  ;;  %3298 = vrot.lane.b32.xlu1 %v3297_v58, %s4968_s24  ;;  %v1568_v6 = vsel %vm576_vm2, %v1565_v13, %v4603_v33  ;;  %v1461_v39 = vsel %vm466_vm5, %v1458_v40, %v4613_v23  ;;  %v1501_v36 = vrot.slane %v4583_v12, 3  ;;  %v1649_v5 = vrot.slane %v4583_v12, 7 }
 0x321   : > { %v1609_v8 = vsel %vm618_vm4, %v1606_v14, %v4618_v27  ;;  %v3312_v47 = vpack.i.bf16 %v1420_v10, %v1568_v6  ;;  %v1762_v2 = vsel %vm424_vm3, %v4600_v49, %v1761_v7  ;;  %v1798_v20 = vsel %vm576_vm2, %v4603_v33, %v1797_v28 }
 0x322   : > { %v3317_v48 = vpack.i.bf16 %v1461_v39, %v1609_v8  ;;  %v1502_v61 = vsel %vm508_vm7, %v1499_v51, %v1501_v36  ;;  %v1650_v50 = vsel %vm660_vm6, %v1647_v16, %v1649_v5  ;;  %v1781_v56 = vrot.slane %v4605_v26, 3 }
 0x323   : > { %v1817_v4 = vrot.slane %v4605_v26, 7  ;;  %v1773_v55 = vrot.slane %v4640_v37, 2  ;;  %v1809_v29 = vrot.slane %v4640_v37, 6  ;;  %v3322_v53 = vpack.i.bf16 %v1502_v61, %v1650_v50 }
 0x324   : > { %3303 = vrot.lane.b32.xlu0 %v3302_v34, %s4969_s17  ;;  %3308 = vrot.lane.b32.xlu1 %v3307_v62, %s4967_s23  ;;  %v3327_v25 = vpack.i.bf16 %v1762_v2, %v1798_v20  ;;  %v1772_v11 = vsel %vm466_vm5, %v4613_v23, %v1771_v41  ;;  %v1808_v13 = vsel %vm618_vm4, %v4618_v27, %v1807_v31  ;;  %v1783_v17 = vrot.slane %v4640_v37, 3 }
 0x325   : > { %v1782_v40 = vsel %vm508_vm7, %v1501_v36, %v1781_v56  ;;  %v1818_v14 = vsel %vm660_vm6, %v1649_v5, %v1817_v4  ;;  %v3332_v51 = vpack.i.bf16 %v1772_v11, %v1808_v13  ;;  %v1764_v16 = vsel %vm424_vm3, %v1761_v7, %v1763_v52 }
 0x326   : > { %v1819_v0 = vrot.slane %v4640_v37, 7  ;;  %v3342_v18 = vpack.i.bf16 %v1782_v40, %v1818_v14  ;;  %v1800_v58 = vsel %vm576_vm2, %v1797_v28, %v1799_v44  ;;  %v1774_v38 = vsel %vm466_vm5, %v1771_v41, %v1773_v55  ;;  %v2156_v40 = vld [vmem:[%s4952_s7 + $0x10] sm:$0xff]  ;;  %v2157_v14 = vld [vmem:[%s4952_s7 + $0x18] sm:$0xff] }
 0x327   : > { %v1810_v63 = vsel %vm618_vm4, %v1807_v31, %v1809_v29  ;;  %v1421_v19 = vrot.slane %v4660_v43, 1  ;;  %v1569_v35 = vrot.slane %v4660_v43, 5  ;;  %v3337_v7 = vpack.i.bf16 %v1764_v16, %v1800_v58 }
 0x328   : > { %3313 = vrot.lane.b32.xlu0 %v3312_v47, %s4968_s24  ;;  %3318 = vrot.lane.b32.xlu1 %v3317_v48, %s4969_s17  ;;  %v3347_v34 = vpack.i.bf16 %v1774_v38, %v1810_v63  ;;  %v1784_v62 = vsel %vm508_vm7, %v1781_v56, %v1783_v17  ;;  %v1820_v10 = vsel %vm660_vm6, %v1817_v4, %v1819_v0  ;;  %v1462_v28 = vrot.slane %v4660_v43, 2 }
 0x329   : > { %v1610_v6 = vrot.slane %v4660_v43, 6  ;;  %v1422_v39 = vsel %vm424_vm3, %v4600_v49, %v1421_v19  ;;  %v1570_v8 = vsel %vm576_vm2, %v4603_v33, %v1569_v35  ;;  %v1503_v41 = vrot.slane %v4660_v43, 3 }
 0x32a   : > { %v1651_v31 = vrot.slane %v4660_v43, 7  ;;  %v3352_v47 = vpack.i.bf16 %v1784_v62, %v1820_v10  ;;  %v3357_v48 = vpack.i.bf16 %v1422_v39, %v1570_v8  ;;  %v1463_v2 = vsel %vm466_vm5, %v4613_v23, %v1462_v28  ;;  %v2158_v39 = vld [vmem:[%s4952_s7 + $0x20] sm:$0xff]  ;;  %v2159_v8 = vld [vmem:[%s4952_s7 + $0x28] sm:$0xff] }
 0x32b   : > { %v1611_v20 = vsel %vm618_vm4, %v4618_v27, %v1610_v6  ;;  %v1504_v49 = vsel %vm508_vm7, %v1501_v36, %v1503_v41  ;;  %v1532_v56 = vrot.slane %v4355_v21, 4  ;;  %v1530_v27 = vrot.slane %v4313_v32, 4 }
 0x32c   : > { %3323 = vrot.lane.b32.xlu0 %v3322_v53, %s4967_s23  ;;  %3328 = vrot.lane.b32.xlu1 %v3327_v25, %s4968_s24  ;;  %v1652_v33 = vsel %vm660_vm6, %v1649_v5, %v1651_v31  ;;  %v3362_v61 = vpack.i.bf16 %v1463_v2, %v1611_v20  ;;  %v1534_v13 = vrot.slane %v4357_v22, 4  ;;  %v2996_v19 = vpack.c.bf16 %v2157_v14, %v2156_v40  ;;  %v2162_v40 = vld [vmem:[%s4952_s7 + $0x40] sm:$0xff] }
 0x32d   : > { %v3367_v50 = vpack.i.bf16 %v1504_v49, %v1652_v33  ;;  %v1533_v55 = vsel %vm550_vm8, %v1530_v27, %v1532_v56 }
 0x330   : > { %3333 = vrot.lane.b32.xlu0 %v3332_v51, %s4969_s17  ;;  %3343 = vrot.lane.b32.xlu1 %v3342_v18, %s4967_s23 }
 0x334   : > { %3338 = vrot.lane.b32.xlu0 %v3337_v7, %s4968_s24  ;;  %3348 = vrot.lane.b32.xlu1 %v3347_v34, %s4969_s17  ;;  %v1535_v34 = vsel %vm550_vm8, %v1532_v56, %v1534_v13 }
 0x338   : > { %3353 = vrot.lane.b32.xlu0 %v3352_v47, %s4967_s23  ;;  %3358 = vrot.lane.b32.xlu1 %v3357_v48, %s4968_s24  ;;  %v1536_v47 = vrot.slane %v4453_v9, 4 }
 0x33c   : > { %3363 = vrot.lane.b32.xlu0 %v3362_v61, %s4969_s17  ;;  %3368 = vrot.lane.b32.xlu1 %v3367_v50, %s4967_s23  ;;  %v3000_v50 = vpack.c.bf16 %v2159_v8, %v2158_v39  ;;  %s323_s23 = sand.u32 1, %s3426_s10  }
 0x33d   : > { %s2394_s21 = sshll.u32 %s323_s23, 6  ;;  %s4904_s13 = scalar_lea.sflag [#allocation4], %s323_s23 }
 0x33e   : > { %s4883_s27 = scalar_lea.vmem [#allocation3], %s2394_s21 }
 0x33f   : > { %s2328_s22 = sshll.u32 %s4883_s27, 4  ;;  %s4898_s22 = int_to_ptr.vmem [resolvable:$true] %s2328_s22 }
 0x340   : > { %s3372_s16 = scalar_lea.vmem %s4898_s22, 1024  ;;  %p3379_p0 = scmp.lt.s32.totalorder %s4898_s22, %s3377_s1 }
 0x341   : > { %p3373_p11 = scmp.ne.s32.totalorder %s4898_s22, %s3372_s16  ;;  %p3380_p1 = scmp.lt.s32.totalorder %s3378_s26, %s3372_s16 }
 0x343   : > { %p3374_p12 = pnand %p3373_p11, %p3532_p5  ;;  %p3381_p2 = por %p3380_p1, %p3379_p0 }
 0x345   : > { %p3375_p13 = pneg %p3374_p12 }
 0x347   : > { %p3382_p3 = pnand %p3381_p2, %p3375_p13 }
 0x376   : > { %v3224_v23 = vpop.permute.xlu0 %3223  ;;  %v3229_v4 = vpop.permute.xlu1 %3228 }
 0x377   : > { %v3226_v52 = vunpack.i.h.bf16 %v3224_v23  ;;  %v3225_v36 = vunpack.i.l.bf16 %v3224_v23  ;;  %v3231_v44 = vunpack.i.h.bf16 %v3229_v4  ;;  %v3230_v5 = vunpack.i.l.bf16 %v3229_v4  ;;  %v2161_v23 = vld [vmem:[%s4952_s7 + $0x38] sm:$0xff] }
 0x379   : > { %v1678_v29 = vsel %vm333_vm0, %v4313_v32, %v3226_v52  ;;  %v1702_v53 = vsel %vm333_vm0, %v1533_v55, %v3225_v36  ;;  %v1537_v36 = vsel %vm550_vm8, %v1534_v13, %v1536_v47  ;;  %v2163_v13 = vld [vmem:[%s4952_s7 + $0x48] sm:$0xff] }
 0x37a   : > { %v3234_v25 = vpop.permute.xlu0 %3233  ;;  %v3239_v11 = vpop.permute.xlu1 %3238  ;;  %v1686_v17 = vsel %vm710_vm9, %v1678_v29, %v3231_v44  ;;  %v1710_v58 = vsel %vm710_vm9, %v1702_v53, %v3230_v5  ;;  %v2167_v32 = vld [vmem:[%s4952_s7 + $0x68] sm:$0xff] }
 0x37b   : > { %v3236_v51 = vunpack.i.h.bf16 %v3234_v25  ;;  %v3235_v16 = vunpack.i.l.bf16 %v3234_v25  ;;  %v3241_v0 = vunpack.i.h.bf16 %v3239_v11  ;;  %v3240_v18 = vunpack.i.l.bf16 %v3239_v11 }
 0x37d   : > { %v4712_v38 = vsel %vm719_vm10, %v1710_v58, %v3235_v16  ;;  %v4715_v63 = vsel %vm719_vm10, %v1686_v17, %v3236_v51  ;;  %v1703_v41 = vsel %vm333_vm0, %v1535_v34, %v3240_v18  ;;  %v1679_v31 = vsel %vm333_vm0, %v4355_v21, %v3241_v0  ;;  %v2164_v34 = vld [vmem:[%s4952_s7 + $0x50] sm:$0xff] }
 0x37e   : > { %v3244_v35 = vpop.permute.xlu0 %3243  ;;  %v3249_v7 = vpop.permute.xlu1 %3248  ;;  %1936 = vmatprep.mubr.f32.mxu1 %v4712_v38  ;;  %v1538_v17 = vrot.slane %v4455_v54, 4  ;;  %v1529_v0 = vrot.slane %v4437_v3, 4 }
 0x37f   : > { %v3246_v62 = vunpack.i.h.bf16 %v3244_v35  ;;  %v3245_v10 = vunpack.i.l.bf16 %v3244_v35  ;;  %v3251_v28 = vunpack.i.h.bf16 %v3249_v7  ;;  %v3250_v6 = vunpack.i.l.bf16 %v3249_v7  ;;  %1937 = vmatmul.mubr.f32.vlgmr.msra.gmra.mrb[16].mxu1 %v4715_v63 }
 0x380   : > { %2995 = vmatpush3.bf16.msra.mxu1 %v4551_v46  ;;  %v2160_v46 = vld [vmem:[%s4952_s7 + $0x30] sm:$0xff]  ;;  %v3008_v7 = vpack.c.bf16 %v2163_v13, %v2162_v40  ;;  %v1531_v39 = vsel %vm550_vm8, %v1529_v0, %v1530_v27  ;;  %v2169_v13 = vld [vmem:[%s4952_s7 + $0x78] sm:$0xff] }
 0x381   : > { %v1711_v48 = vsel %vm710_vm9, %v1703_v41, %v3245_v10  ;;  %v1687_v2 = vsel %vm710_vm9, %v1679_v31, %v3246_v62  ;;  %2997 = vmatprep.subr.bf16.mxu1 %v2996_v19  ;;  %v3004_v53 = vpack.c.bf16 %v2161_v23, %v2160_v46  ;;  %v2165_v62 = vld [vmem:[%s4952_s7 + $0x58] sm:$0xff]  ;;  %v2168_v40 = vld [vmem:[%s4952_s7 + $0x70] sm:$0xff] }
 0x382   : > { %v3254_v20 = vpop.permute.xlu0 %3253  ;;  %v3259_v49 = vpop.permute.xlu1 %3258  ;;  %v4734_v33 = vsel %vm719_vm10, %v1711_v48, %v3250_v6  ;;  %v4737_v61 = vsel %vm719_vm10, %v1687_v2, %v3251_v28  ;;  %v1539_v6 = vsel %vm550_vm8, %v1536_v47, %v1538_v17  ;;  %v3012_v2 = vpack.c.bf16 %v2165_v62, %v2164_v34  ;;  %v2166_v47 = vld [vmem:[%s4952_s7 + $0x60] sm:$0xff] }
 0x383   : > { %v3256_v56 = vunpack.i.h.bf16 %v3254_v20  ;;  %v3255_v21 = vunpack.i.l.bf16 %v3254_v20  ;;  %1941 = vmatprep.mubr.f32.mxu1 %v4734_v33  ;;  %v3261_v4 = vunpack.i.h.bf16 %v3259_v49  ;;  %v3260_v52 = vunpack.i.l.bf16 %v3259_v49 }
 0x384   : > { %1942 = vmatmul.mubr.f32.gmra.mrb[18].mxu1 %v4737_v61 }
 0x385   : > { %v1704_v44 = vsel %vm333_vm0, %v1537_v36, %v3255_v21  ;;  %v1680_v5 = vsel %vm333_vm0, %v4357_v22, %v3256_v56  ;;  %2999 = vmatpush3.bf16.msra.mxu1 %v2996_v19 }
 0x386   : > { %v3264_v55 = vpop.permute.xlu0 %3263  ;;  %v3269_v29 = vpop.permute.xlu1 %3268  ;;  %3001 = vmatprep.subr.bf16.mxu1 %v3000_v50  ;;  %v1712_v14 = vsel %vm710_vm9, %v1704_v44, %v3260_v52  ;;  %v1688_v51 = vsel %vm710_vm9, %v1680_v5, %v3261_v4  ;;  %v1540_v5 = vrot.slane %v4577_v24, 4 }
 0x387   : > { %v3266_v25 = vunpack.i.h.bf16 %v3264_v55  ;;  %v3265_v11 = vunpack.i.l.bf16 %v3264_v55  ;;  %v3271_v18 = vunpack.i.h.bf16 %v3269_v29  ;;  %v3270_v58 = vunpack.i.l.bf16 %v3269_v29 }
 0x388   : > { %v3016_v55 = vpack.c.bf16 %v2167_v32, %v2166_v47 }
 0x389   : > { %v4760_v22 = vsel %vm719_vm10, %v1712_v14, %v3265_v11  ;;  %v4763_v16 = vsel %vm719_vm10, %v1688_v51, %v3266_v25  ;;  %3003 = vmatpush3.bf16.msra.mxu1 %v3000_v50  ;;  %v1705_v31 = vsel %vm333_vm0, %v1539_v6, %v3271_v18  ;;  %v1701_v48 = vsel %vm333_vm0, %v1531_v39, %v3270_v58 }
 0x38a   : > { %v3274_v19 = vpop.permute.xlu0 %3273  ;;  %v3279_v35 = vpop.permute.xlu1 %3278  ;;  %1946 = vmatprep.mubr.f32.mxu1 %v4760_v22  ;;  %3005 = vmatprep.subr.bf16.mxu1 %v3004_v53 }
 0x38b   : > { %1947 = vmatmul.mubr.f32.gmra.mrb[20].mxu1 %v4763_v16  ;;  %v3281_v10 = vunpack.i.h.bf16 %v3279_v35  ;;  %v3280_v28 = vunpack.i.l.bf16 %v3279_v35  ;;  %v3276_v20 = vunpack.i.h.bf16 %v3274_v19  ;;  %v3275_v49 = vunpack.i.l.bf16 %v3274_v19 }
 0x38c   : > { %v1541_v35 = vsel %vm550_vm8, %v1538_v17, %v1540_v5 }
 0x38d   : > { %3007 = vmatpush3.bf16.msra.mxu1 %v3004_v53  ;;  %v1713_v46 = vsel %vm710_vm9, %v1705_v31, %v3281_v10  ;;  %v1709_v23 = vsel %vm710_vm9, %v1701_v48, %v3280_v28  ;;  %v1677_v29 = vsel %vm333_vm0, %v4437_v3, %v3275_v49  ;;  %v1681_v11 = vsel %vm333_vm0, %v4453_v9, %v3276_v20 }
 0x38e   : > { %v3284_v8 = vpop.permute.xlu0 %3283  ;;  %v3289_v41 = vpop.permute.xlu1 %3288  ;;  %3009 = vmatprep.subr.bf16.mxu1 %v3008_v7 }
 0x38f   : > { %v3291_v50 = vunpack.i.h.bf16 %v3289_v41  ;;  %v3290_v56 = vunpack.i.l.bf16 %v3289_v41  ;;  %v3286_v27 = vunpack.i.h.bf16 %v3284_v8  ;;  %v3285_v21 = vunpack.i.l.bf16 %v3284_v8 }
 0x390   : > { %v4818_v8 = vrot.slane %v4583_v12, 4 }
 0x391   : > { %v4790_v4 = vsel %vm719_vm10, %v1713_v46, %v3291_v50  ;;  %v1717_v52 = vsel %vm719_vm10, %v1709_v23, %v3290_v56  ;;  %3011 = vmatpush3.bf16.msra.mxu1 %v3008_v7  ;;  %v1685_v14 = vsel %vm710_vm9, %v1677_v29, %v3285_v21  ;;  %v1689_v3 = vsel %vm710_vm9, %v1681_v11, %v3286_v27 }
 0x392   : > { %v3294_v36 = vpop.permute.xlu0 %3293  ;;  %v3299_v44 = vpop.permute.xlu1 %3298  ;;  %1951 = vmatprep.mubr.f32.mxu1 %v4790_v4  ;;  %2041 = vmatprep.mubr.f32.mxu0 %v1717_v52  ;;  %v3020_v7 = vpack.c.bf16 %v2169_v13, %v2168_v40  ;;  %v1543_v56 = vsel %vm550_vm8, %v1540_v5, %v4818_v8  ;;  %v1791_v21 = vrot.slane %v4605_v26, 4 }
 0x393   : > { %v3296_v53 = vunpack.i.h.bf16 %v3294_v36  ;;  %v3295_v25 = vunpack.i.l.bf16 %v3294_v36  ;;  %3013 = vmatprep.subr.bf16.mxu1 %v3012_v2  ;;  %v3301_v51 = vunpack.i.h.bf16 %v3299_v44  ;;  %v3300_v0 = vunpack.i.l.bf16 %v3299_v44 }
 0x395   : > { %v4808_v18 = vsel %vm719_vm10, %v1689_v3, %v3296_v53  ;;  %v1693_v9 = vsel %vm719_vm10, %v1685_v14, %v3295_v25  ;;  %3015 = vmatpush3.bf16.msra.mxu1 %v3012_v2  ;;  %v1706_v6 = vsel %vm333_vm0, %v1541_v35, %v3300_v0  ;;  %v1682_v39 = vsel %vm333_vm0, %v4455_v54, %v3301_v51 }
 0x396   : > { %v3304_v58 = vpop.permute.xlu0 %3303  ;;  %v3309_v19 = vpop.permute.xlu1 %3308  ;;  %1952 = vmatmul.mubr.f32.gmra.mrb[22].mxu1 %v4808_v18  ;;  %2042 = vmatmul.mubr.f32.vlgmr.msra.gmra.mrb[24].mxu0 %v1693_v9  ;;  %v1793_v14 = vrot.slane %v4640_v37, 4 }
 0x397   : > { %v3306_v34 = vunpack.i.h.bf16 %v3304_v58  ;;  %v3305_v62 = vunpack.i.l.bf16 %v3304_v58  ;;  %v3311_v10 = vunpack.i.h.bf16 %v3309_v19  ;;  %v3310_v28 = vunpack.i.l.bf16 %v3309_v19  ;;  %2046 = vmatprep.mubr.f32.mxu0 %v4712_v38  ;;  %3017 = vmatprep.subr.bf16.mxu1 %v3016_v55 }
 0x398   : > { %v1794_v37 = vsel %vm550_vm8, %v1791_v21, %v1793_v14 }
 0x399   : > { %v1714_v41 = vsel %vm710_vm9, %v1706_v6, %v3305_v62  ;;  %v1690_v17 = vsel %vm710_vm9, %v1682_v39, %v3306_v34  ;;  %3019 = vmatpush3.bf16.msra.mxu1 %v3016_v55 }
 0x39a   : > { %v3314_v31 = vpop.permute.xlu0 %3313  ;;  %v3319_v48 = vpop.permute.xlu1 %3318  ;;  %2047 = vmatmul.mubr.f32.gmra.mrb[26].mxu0 %v4715_v63  ;;  %v1722_v38 = vsel %vm719_vm10, %v1714_v41, %v3310_v28  ;;  %v1698_v2 = vsel %vm719_vm10, %v1690_v17, %v3311_v10  ;;  %3021 = vmatprep.subr.bf16.mxu1 %v3020_v7  ;;  %v1544_v28 = vrot.slane %v4660_v43, 4 }
 0x39b   : > { %v3316_v20 = vunpack.i.h.bf16 %v3314_v31  ;;  %v3315_v49 = vunpack.i.l.bf16 %v3314_v31  ;;  %1956 = vmatprep.mubr.f32.mxu1 %v1722_v38  ;;  %2051 = vmatprep.mubr.f32.mxu0 %v4734_v33  ;;  %v3321_v54 = vunpack.i.h.bf16 %v3319_v48  ;;  %v3320_v50 = vunpack.i.l.bf16 %v3319_v48 }
 0x39c   : > { %1957 = vmatmul.mubr.f32.gmra.mrb[24].mxu1 %v1698_v2  ;;  %v1545_v43 = vsel %vm550_vm8, %v4818_v8, %v1544_v28 }
 0x39d   : > { %v1707_v47 = vsel %vm333_vm0, %v1543_v56, %v3315_v49  ;;  %v1683_v63 = vsel %vm333_vm0, %v4577_v24, %v3316_v20  ;;  %3023 = vmatpush3.bf16.msra.mxu1 %v3020_v7 }
 0x39e   : > { %v3324_v32 = vpop.permute.xlu0 %3323  ;;  %v3329_v27 = vpop.permute.xlu1 %3328  ;;  %2052 = vmatmul.mubr.f32.gmra.mrb[28].mxu0 %v4737_v61  ;;  %v1715_v36 = vsel %vm710_vm9, %v1707_v47, %v3320_v50  ;;  %v1691_v44 = vsel %vm710_vm9, %v1683_v63, %v3321_v54  ;;  %v1792_v61 = vsel %vm550_vm8, %v4818_v8, %v1791_v21 }
 0x39f   : > { %v3326_v46 = vunpack.i.h.bf16 %v3324_v32  ;;  %v3325_v33 = vunpack.i.l.bf16 %v3324_v32  ;;  %2056 = vmatprep.mubr.f32.mxu0 %v4760_v22  ;;  %v3331_v23 = vunpack.i.h.bf16 %v3329_v27  ;;  %v3330_v52 = vunpack.i.l.bf16 %v3329_v27 }
 0x3a1   : > { %v1723_v5 = vsel %vm719_vm10, %v1715_v36, %v3325_v33  ;;  %v1699_v24 = vsel %vm719_vm10, %v1691_v44, %v3326_v46  ;;  %v1833_v40 = vsel %vm333_vm0, %v1792_v61, %v3330_v52  ;;  %v1827_v13 = vsel %vm333_vm0, %v4583_v12, %v3331_v23 }
 0x3a2   : > { %v3334_v55 = vpop.permute.xlu0 %3333  ;;  %v3344_v29 = vpop.permute.xlu1 %3343  ;;  %1961 = vmatprep.mubr.f32.mxu1 %v1723_v5  ;;  %2057 = vmatmul.mubr.f32.gmra.mrb[30].mxu0 %v4763_v16 }
 0x3a3   : > { %v3336_v53 = vunpack.i.h.bf16 %v3334_v55  ;;  %v3335_v22 = vunpack.i.l.bf16 %v3334_v55  ;;  %v3346_v25 = vunpack.i.h.bf16 %v3344_v29  ;;  %v3345_v11 = vunpack.i.l.bf16 %v3344_v29  ;;  %1962 = vmatmul.mubr.f32.gmra.mrb[26].mxu1 %v1699_v24  ;;  %2061 = vmatprep.mubr.f32.mxu0 %v4790_v4 }
 0x3a5   : > { %v1835_v51 = vsel %vm710_vm9, %v1833_v40, %v3335_v22  ;;  %v1829_v16 = vsel %vm710_vm9, %v1827_v13, %v3336_v53 }
 0x3a6   : > { %v3339_v0 = vpop.permute.xlu0 %3338  ;;  %v3349_v3 = vpop.permute.xlu1 %3348  ;;  %2062 = vmatmul.mubr.f32.gmra.mrb[32].mxu0 %v4808_v18  ;;  %v1837_v9 = vsel %vm719_vm10, %v1835_v51, %v3345_v11  ;;  %v1831_v58 = vsel %vm719_vm10, %v1829_v16, %v3346_v25 }
 0x3a7   : > { %v3341_v4 = vunpack.i.h.bf16 %v3339_v0  ;;  %v3340_v19 = vunpack.i.l.bf16 %v3339_v0  ;;  %1966 = vmatprep.mubr.f32.mxu1 %v1837_v9  ;;  %2066 = vmatprep.mubr.f32.mxu0 %v1722_v38  ;;  %v3351_v35 = vunpack.i.h.bf16 %v3349_v3  ;;  %v3350_v7 = vunpack.i.l.bf16 %v3349_v3 }
 0x3a8   : > { %1967 = vmatmul.mubr.f32.gmra.mrb[28].mxu1 %v1831_v58 }
 0x3a9   : > { %v1834_v34 = vsel %vm333_vm0, %v1794_v37, %v3340_v19  ;;  %v1828_v62 = vsel %vm333_vm0, %v4605_v26, %v3341_v4 }
 0x3aa   : > { %v3354_v10 = vpop.permute.xlu0 %3353  ;;  %v3359_v18 = vpop.permute.xlu1 %3358  ;;  %2067 = vmatmul.mubr.f32.gmra.mrb[34].mxu0 %v1698_v2  ;;  %v1836_v31 = vsel %vm710_vm9, %v1834_v34, %v3350_v7  ;;  %v1830_v48 = vsel %vm710_vm9, %v1828_v62, %v3351_v35 }
 0x3ab   : > { %v3356_v6 = vunpack.i.h.bf16 %v3354_v10  ;;  %v3355_v39 = vunpack.i.l.bf16 %v3354_v10  ;;  %2071 = vmatprep.mubr.f32.mxu0 %v1723_v5  ;;  %v3361_v41 = vunpack.i.h.bf16 %v3359_v18  ;;  %v3360_v17 = vunpack.i.l.bf16 %v3359_v18 }
 0x3ad   : > { %v1838_v38 = vsel %vm719_vm10, %v1836_v31, %v3355_v39  ;;  %v1832_v20 = vsel %vm719_vm10, %v1830_v48, %v3356_v6  ;;  %v1708_v47 = vsel %vm333_vm0, %v1545_v43, %v3360_v17  ;;  %v1684_v63 = vsel %vm333_vm0, %v4583_v12, %v3361_v41  ;;  %v2464_v43 = vld [vmem:[%s4953_s8] ss:$0 sm:$0xff] }
 0x3ae   : > { %v3364_v49 = vpop.permute.xlu0 %3363  ;;  %v3369_v26 = vpop.permute.xlu1 %3368  ;;  %1971 = vmatprep.mubr.f32.mxu1 %v1838_v38  ;;  %2072 = vmatmul.mubr.f32.gmra.mrb[36].mxu0 %v1699_v24 }
 0x3af   : > { %v3366_v2 = vunpack.i.h.bf16 %v3364_v49  ;;  %v3365_v54 = vunpack.i.l.bf16 %v3364_v49  ;;  %v3371_v50 = vunpack.i.h.bf16 %v3369_v26  ;;  %v3370_v56 = vunpack.i.l.bf16 %v3369_v26  ;;  %1972 = vmatmul.mubr.f32.gmra.mrb[30].mxu1 %v1832_v20 }
 0x3b0   : > { %2820 = vmatprep.mubr.f32.mxu1 %v4192_v59 }
 0x3b1   : > { %v1716_v32 = vsel %vm710_vm9, %v1708_v47, %v3365_v54  ;;  %v1692_v27 = vsel %vm710_vm9, %v1684_v63, %v3366_v2 }
 0x3b2   : > { %v1724_v21 = vsel %vm719_vm10, %v1716_v32, %v3370_v56  ;;  %v1700_v8 = vsel %vm719_vm10, %v1692_v27, %v3371_v50 }
 0x3b3   : > { %2076 = vmatprep.mubr.f32.mxu0 %v1724_v21  ;;  %2821 = vmatmul.mubr.f32.vlgmr.msra.gmra.mrb[32].mxu1 %v4198_v60 }
 0x3b4   : > { %2077 = vmatmul.mubr.f32.gmra.mrb[38].mxu0 %v1700_v8  ;;  %2823 = vmatprep.mubr.f32.mxu1 %v4204_v42 }
 0x3b7   : > { %2824 = vmatmul.mubr.f32.gmra.mrb[34].mxu1 %v4210_v30 }
 0x3b8   : > { %2826 = vmatprep.mubr.f32.mxu1 %v4216_v45 }
 0x3bb   : > { %2827 = vmatmul.mubr.f32.gmra.mrb[36].mxu1 %v4221_v57 }
 0x3bc   : > { %2829 = vmatprep.mubr.f32.mxu1 %v4226_v15 }
 0x3bf   : > { %2830 = vmatmul.mubr.f32.gmra.mrb[38].mxu1 %v4229_v1 }
 0x452   : > { %v2640_v59 = vpop.f32.mrb[16].mxu1 }
 0x453   : > { %v2641_v12 = vpop.f32.mrb[17].mxu1 }
 0x454   : > { %v2642_v46 = vadd.f32 %v2641_v12, %v2640_v59 }
 0x457   : > { %v2643_v33 = vpop.f32.mrb[18].mxu1 }
 0x458   : > { %v2644_v23 = vpop.f32.mrb[19].mxu1 }
 0x459   : > { %v2645_v52 = vadd.f32 %v2644_v23, %v2643_v33 }
 0x45e   : > { %v2646_v60 = vpop.f32.mrb[20].mxu1 }
 0x45f   : > { %v2647_v36 = vpop.f32.mrb[21].mxu1 }
 0x460   : > { %v2648_v44 = vadd.f32 %v2647_v36, %v2646_v60 }
 0x469   : > { %v2649_v42 = vpop.f32.mrb[22].mxu1  ;;  %v2696_v5 = vpop.f32.mrb[24].mxu0 }
 0x46a   : > { %v2650_v30 = vpop.f32.mrb[23].mxu1  ;;  %v2697_v24 = vpop.f32.mrb[25].mxu0 }
 0x46b   : > { %v2651_v45 = vadd.f32 %v2650_v30, %v2649_v42  ;;  %v2698_v55 = vadd.f32 %v2697_v24, %v2696_v5 }
 0x46d   : > { %v2699_v57 = vpop.f32.mrb[26].mxu0  ;;  %v2044_v29 = vadd.f32 %v2698_v55, %v2642_v46 }
 0x46e   : > { %v2700_v15 = vpop.f32.mrb[27].mxu0 }
 0x46f   : > { %v2701_v61 = vadd.f32 %v2700_v15, %v2699_v57  ;;  %v2652_v1 = vpop.f32.mrb[24].mxu1 }
 0x470   : > { %v2653_v53 = vpop.f32.mrb[25].mxu1 }
 0x471   : > { %v2654_v22 = vadd.f32 %v2653_v53, %v2652_v1  ;;  %v2702_v25 = vpop.f32.mrb[28].mxu0  ;;  %v2049_v11 = vadd.f32 %v2701_v61, %v2645_v52 }
 0x472   : > { %v2703_v40 = vpop.f32.mrb[29].mxu0 }
 0x473   : > { %v2704_v13 = vadd.f32 %v2703_v40, %v2702_v25 }
 0x475   : > { %v2705_v14 = vpop.f32.mrb[30].mxu0  ;;  %v2054_v51 = vadd.f32 %v2704_v13, %v2648_v44 }
 0x476   : > { %v2655_v16 = vpop.f32.mrb[26].mxu1  ;;  %v2706_v0 = vpop.f32.mrb[31].mxu0 }
 0x477   : > { %v2707_v3 = vadd.f32 %v2706_v0, %v2705_v14  ;;  %v2656_v9 = vpop.f32.mrb[27].mxu1 }
 0x478   : > { %v2657_v58 = vadd.f32 %v2656_v9, %v2655_v16 }
 0x479   : > { %v2708_v4 = vpop.f32.mrb[32].mxu0  ;;  %v2059_v19 = vadd.f32 %v2707_v3, %v2651_v45 }
 0x47a   : > { %v2709_v35 = vpop.f32.mrb[33].mxu0 }
 0x47b   : > { %v2710_v7 = vadd.f32 %v2709_v35, %v2708_v4  ;;  %v2658_v37 = vpop.f32.mrb[28].mxu1 }
 0x47c   : > { %v2659_v34 = vpop.f32.mrb[29].mxu1 }
 0x47d   : > { %v2660_v62 = vadd.f32 %v2659_v34, %v2658_v37  ;;  %v2711_v10 = vpop.f32.mrb[34].mxu0  ;;  %v2064_v18 = vadd.f32 %v2710_v7, %v2654_v22 }
 0x47e   : > { %v2712_v28 = vpop.f32.mrb[35].mxu0 }
 0x47f   : > { %v2713_v6 = vadd.f32 %v2712_v28, %v2711_v10 }
 0x481   : > { %v2714_v39 = vpop.f32.mrb[36].mxu0  ;;  %v2069_v41 = vadd.f32 %v2713_v6, %v2657_v58 }
 0x482   : > { %v2661_v17 = vpop.f32.mrb[30].mxu1  ;;  %v2715_v31 = vpop.f32.mrb[37].mxu0 }
 0x483   : > { %v2716_v48 = vadd.f32 %v2715_v31, %v2714_v39  ;;  %v2662_v38 = vpop.f32.mrb[31].mxu1 }
 0x484   : > { %v2663_v20 = vadd.f32 %v2662_v38, %v2661_v17 }
 0x485   : > { %v2074_v49 = vadd.f32 %v2716_v48, %v2660_v62 }
 0x486   : > { %v2822_v26 = vpop.f32.mrb[32].mxu1 }
 0x487   : > { %v2276_v2 = vadd.f32 %v2822_v26, %v2049_v11  ;;  %v2717_v54 = vpop.f32.mrb[38].mxu0  ;;  %v2236_v50 = vpop.f32.mrb[33].mxu1 }
 0x488   : > { %v2275_v56 = vadd.f32 %v2236_v50, %v2044_v29  ;;  %v2718_v47 = vpop.f32.mrb[39].mxu0 }
 0x489   : > { %v2291_v63 = vadd.f32 %v2464_v43, %v2276_v2  ;;  %v2719_v32 = vadd.f32 %v2718_v47, %v2717_v54 }
 0x48a   : > { %v2290_v27 = vadd.f32 %v2464_v43, %v2275_v56  ;;  %v2825_v21 = vpop.f32.mrb[34].mxu1 }
 0x48b   : > { %v2299_v8 = vmax.f32 %v2291_v63, 0.0  ;;  %v2278_v59 = vadd.f32 %v2825_v21, %v2059_v19  ;;  %v2246_v12 = vpop.f32.mrb[35].mxu1  ;;  %v2079_v46 = vadd.f32 %v2719_v32, %v2663_v20 }
 0x48c   : > { %v2298_v33 = vmax.f32 %v2290_v27, 0.0  ;;  %v2277_v23 = vadd.f32 %v2246_v12, %v2054_v51 }
 0x48d   : > { %2307 = vst [vmem:[%s4883_s27 + $0x8] sm:$0xff] %v2299_v8  ;;  %v2293_v52 = vadd.f32 %v2464_v43, %v2278_v59 }
 0x48e   : > { %2306 = vst [vmem:[%s4883_s27] sm:$0xff] %v2298_v33  ;;  %v2292_v60 = vadd.f32 %v2464_v43, %v2277_v23  ;;  %v2828_v36 = vpop.f32.mrb[36].mxu1 }
 0x48f   : > { %v2301_v44 = vmax.f32 %v2293_v52, 0.0  ;;  %v2280_v42 = vadd.f32 %v2828_v36, %v2069_v41  ;;  %v2256_v5 = vpop.f32.mrb[37].mxu1 }
 0x490   : > { %v2300_v30 = vmax.f32 %v2292_v60, 0.0  ;;  %v2279_v24 = vadd.f32 %v2256_v5, %v2064_v18 }
 0x491   : > { %2309 = vst [vmem:[%s4883_s27 + $0x18] sm:$0xff] %v2301_v44  ;;  %v2295_v45 = vadd.f32 %v2464_v43, %v2280_v42 }
 0x492   : > { %2308 = vst [vmem:[%s4883_s27 + $0x10] sm:$0xff] %v2300_v30  ;;  %v2294_v55 = vadd.f32 %v2464_v43, %v2279_v24  ;;  %v2831_v57 = vpop.f32.mrb[38].mxu1 }
 0x493   : > { %v2303_v29 = vmax.f32 %v2295_v45, 0.0  ;;  %v2282_v15 = vadd.f32 %v2831_v57, %v2079_v46  ;;  %v2266_v61 = vpop.f32.mrb[39].mxu1 }
 0x494   : > { %v2302_v1 = vmax.f32 %v2294_v55, 0.0  ;;  %v2281_v53 = vadd.f32 %v2266_v61, %v2074_v49 }
 0x495   : > { %2311 = vst [vmem:[%s4883_s27 + $0x28] sm:$0xff] %v2303_v29  ;;  %v2297_v22 = vadd.f32 %v2464_v43, %v2282_v15 }
 0x496   : > { %2310 = vst [vmem:[%s4883_s27 + $0x20] sm:$0xff] %v2302_v1  ;;  %v2296_v25 = vadd.f32 %v2464_v43, %v2281_v53 }
 0x497   : > { %v2305_v11 = vmax.f32 %v2297_v22, 0.0 }
 0x498   : > { %v2304_v40 = vmax.f32 %v2296_v25, 0.0 }
 0x499   : > { %2313 = vst [vmem:[%s4883_s27 + $0x38] sm:$0xff] %v2305_v11 }
 0x49a   : > { %2312 = vst [vmem:[%s4883_s27 + $0x30] sm:$0xff] %v2304_v40 }
 0x49b   : > { %3385 = shalt.err (!%p3382_p3)
}
 0x49c   : > { %s3386_s23 = scalar_lea.hbm %s4896_s14, 1024  ;;  %s3390_s21 = scalar_lea.hbm %s4954_s9, 8192 }
 0x49d   : > { %p3387_p4 = scmp.ne.s32.totalorder %s4896_s14, %s3386_s23  ;;  %p3391_p9 = scmp.lt.u32.totalorder %s4896_s14, %s4954_s9 }
 0x49e   : > { %p3392_p10 = scmp.lt.u32.totalorder %s3390_s21, %s3386_s23  ;;  %p3394_p12 = scmp.lt.u32.totalorder %s3386_s23, %s4896_s14 }
 0x49f   : > { %p3388_p7 = pnand %p3387_p4, %p3532_p5 }
 0x4a0   : > { %p3393_p11 = por %p3392_p10, %p3391_p9 }
 0x4a1   : > { %p3389_p8 = pneg %p3388_p7 }
 0x4a2   : > { %p3395_p13 = por %p3394_p12, %p3393_p11 }
 0x4a4   : > { %p3396_p0 = pnand %p3395_p13, %p3389_p8 }
 0x4a6   : > { %3399 = shalt.err (!%p3396_p0)
}
 0x4a7   : > { %s3442_s28 = smov 128   ;;  %s3443_s29 = smov 8  }
 0x4a8   : > { %3024 = dma.vmem_to_hbm [thread:$0]  (%p3532_p5), %s4898_s22, 1024, %s4896_s14, %s4904_s13, %s3442_s28, %s3442_s28, %s3443_s29  }
 0x4a9 PF: > { %p3030_p1 = scmp.ge.s32.totalorder %s3434_s12, 2  ;;  %s2343_s16 = sand.u32 1, %s3422_s30  }
 0x4aa   : > { %s2344_s25 = scalar_lea.sflag [#allocation4], %s2343_s16 }
 0x4ab   : > { %p3027_p2 = pnand %p3030_p1, %p3536_p6 }
 0x4ad   : > { %3417 = dma.done.wait (!%p3027_p2), %s2344_s25, 1024  }
 0x4ae   : > { %3419 = vsyncadd (!%p3027_p2), %s2344_s25, 4294966272  ;;  %p19_p3 = scmp.ge.s32.totalorder %s3519_s15, 10   ;;  %s4970_s30 = smov %s3426_s10 }
 0x4af   : > { %s4971_s10 = smov %s3430_s11  ;;  %s4972_s11 = smov %s3530_s18 }
 0x4b0   : > { %s4973_s12 = smov %s3519_s15  ;;  %21 = sbr.rel (!%p19_p3) target bundleno = 6 (0x6), region = 93 }
 0x4b7   :  { %2349 = vsyncpa [#allocation4], 1 }
 0x4b8   :  { %2351 = vsyncpa [#allocation4 + $0x1], 1 }

</bundles_post_ra>
